<compile_context>
chip_gen: v7x
topology: tpu7x:2x2x1
jax: 0.10.0
libtpu: 0.0.40
codegen_flags: <defaults>
</compile_context>

<pallas_src>
import functools

import jax
import jax.numpy as jnp
import numpy as np
from jax.experimental import pallas as pl
from jax.experimental.pallas import tpu as pltpu

BN_EPS = 1e-5
LANES = 128
COMPUTE_DTYPE = jnp.float32   # see header: bf16 switch needs a looser tolerance


# ------------------------------ fused kernel ------------------------------- #

def _fused_kernel(*refs, num_layers, T, H, k, Hstride):
    """Whole forward for one batch sample.

    refs = [x_packed,                              # (1, Mw, 128)
            (W_spatial_l, shift_l) * num_layers,   # fused-tap banded weights
            (W_temporal_l, shift_l) * num_layers,  # time flip folded in
            W_final, bias_final,
            out,                                   # (1, Mw, 128)
            buf]                                   # (Rbuf, 128) VMEM scratch
    Row layout: row = t*Hstride + h; rows with h in [H, Hstride) are zero pad,
    plus p zero t-steps on each side of the scratch ('same' conv boundaries).
    """
    p = k // 2
    Mw = T * Hstride           # matmul rows (active h rows + in-step pad rows)
    base = p * Hstride         # start of the active window inside the scratch

    x_ref = refs[0]
    lw = refs[1:1 + 4 * num_layers]
    wf_ref = refs[1 + 4 * num_layers]
    bf_ref = refs[2 + 4 * num_layers]
    o_ref = refs[3 + 4 * num_layers]
    buf = refs[4 + 4 * num_layers]

    # Zero ONLY the temporal pad ring; active rows and in-step pad rows are
    # fully rewritten by every layer's masked full-window store below.
    # (No program_id guard: under v7x megacore each core owns its scratch.)
    buf[0:base, :] = jnp.zeros((base, LANES), buf.dtype)
    buf[base + Mw:, :] = jnp.zeros((buf.shape[0] - base - Mw, LANES), buf.dtype)

    # Row mask: 1 on active h rows, 0 on in-step pad rows, so the next layer's
    # 'same' h boundary keeps reading zeros.
    row = jax.lax.broadcasted_iota(jnp.int32, (Mw, LANES), 0)
    active = (row % Hstride) < H

    def h_shift(slab, dh):
        # slab[r + dh] via an XLU sublane rotate (no relayout copy).  Wrapped
        # rows are either zero pad rows or only feed masked pad output rows.
        return slab if dh == 0 else pltpu.roll(slab, shift=(-dh) % Mw, axis=0)

    def t_slab(dt):
        # 16-row-aligned read of the active window shifted by dt time steps.
        off = base + dt * Hstride
        return buf[off:off + Mw, :]

    def conv(a_mat, w, shift):
        acc = jnp.dot(a_mat, w, preferred_element_type=jnp.float32)
        y = jnp.maximum(acc + shift, 0.0)          # BN shift + ReLU (scale folded)
        return jnp.where(active, y, 0.0)           # keep the h pad rows zero

    # ---- SpatialBlock layer 0: h taps straight off the packed input block ----
    x_slab = x_ref[0].astype(COMPUTE_DTYPE)
    a_mat = jnp.concatenate([h_shift(x_slab, j - p) for j in range(k)], axis=1)
    buf[base:base + Mw, :] = conv(a_mat, lw[0][...], lw[1][...]).astype(buf.dtype)

    # ---- SpatialBlock layers 1..L-1 ----
    for l in range(1, num_layers):
        slab = t_slab(0)
        a_mat = jnp.concatenate([h_shift(slab, j - p) for j in range(k)], axis=1)
        buf[base:base + Mw, :] = conv(
            a_mat, lw[2 * l][...], lw[2 * l + 1][...]).astype(buf.dtype)

    # ---- TemporalReversedBlock (time flip folded into the packed weights) ----
    for l in range(num_layers):
        a_mat = jnp.concatenate([t_slab(i - p) for i in range(k)], axis=1)
        buf[base:base + Mw, :] = conv(
            a_mat, lw[2 * num_layers + 2 * l][...],
            lw[2 * num_layers + 2 * l + 1][...]).astype(buf.dtype)

    # ---- conv_final: k*k (t,h) taps banded over w, + bias, no activation ----
    # Grouped by the t tap (k fused dots) to bound the live MXU operand size.
    acc = None
    for dt in range(k):
        slab = t_slab(dt - p)
        a_mat = jnp.concatenate([h_shift(slab, dh - p) for dh in range(k)], axis=1)
        wg = wf_ref[dt * k * LANES:(dt + 1) * k * LANES, :]
        d = jnp.dot(a_mat, wg, preferred_element_type=jnp.float32)
        acc = d if acc is None else acc + d
    o_ref[...] = (acc + bf_ref[...]).astype(o_ref.dtype).reshape(1, Mw, LANES)


# --------------------------- weight packing (host) -------------------------- #

def _pack_banded_fused(w_taps, Wdim, c_in_slots, c_out_slots, dtype):
    """w_taps: (n_taps, kw, Cin, Cout) -> (n_taps*Wdim*c_in_slots, Wdim*c_out_slots).

    Row block j holds tap j as a width-banded matrix: an activation slab packed
    as lane = w*c_in_slots + c, matmul'd against it, implements a 'same' conv
    along the packed width dim (w-boundary zeros fall outside the band); unused
    channel slots are zero rows / columns.  Taps are stacked along the
    contraction dim so one dot covers all taps."""
    n_taps, kw, Cin, Cout = w_taps.shape
    assert Cin <= c_in_slots and Cout <= c_out_slots
    p = kw // 2
    big = np.zeros((n_taps, Wdim * c_in_slots, Wdim * c_out_slots), np.float32)
    for t in range(n_taps):
        for wo in range(Wdim):
            for l in range(kw):
                wi = wo + l - p
                if 0 <= wi < Wdim:
                    big[t, wi * c_in_slots:wi * c_in_slots + Cin,
                        wo * c_out_slots:wo * c_out_slots + Cout] = w_taps[t, l]
    return jnp.asarray(
        big.reshape(n_taps * Wdim * c_in_slots, Wdim * c_out_slots), dtype)


def pack_params(params, W):
    """Fold BN scale into the weights, fold the time flip into the temporal
    kernels, and pack everything into fused-tap lane-dense banded matrices."""
    c_slots = LANES // W
    layer_inputs = []

    def fold_scale(w5, scale):
        return (np.asarray(w5, np.float32) *
                np.asarray(scale, np.float32)[:, None, None, None, None])

    def lane_vec(v, cout):
        s = np.zeros(c_slots, np.float32)
        s[:cout] = np.asarray(v, np.float32)
        return jnp.asarray(np.tile(s, W)[None, :])        # (1, 128), f32

    for layer in params["spatial"]:
        # Conv3d (1, k, k), no bias: taps over kh, band over kw.
        w5 = fold_scale(layer["w"], layer["scale"])        # (Cout, Cin, 1, kh, kw)
        taps = np.transpose(w5[:, :, 0], (2, 3, 1, 0))     # (kh, kw, Cin, Cout)
        layer_inputs += [_pack_banded_fused(taps, W, c_slots, c_slots, COMPUTE_DTYPE),
                         lane_vec(layer["shift"], w5.shape[0])]
    for layer in params["temporal"]:
        # Conv3d (k, 1, 1), no bias: time-reversed taps over kt (flip folded),
        # block-diagonal over w.
        w5 = fold_scale(layer["w"], layer["scale"])        # (Cout, Cin, kt, 1, 1)
        taps = np.transpose(w5[:, :, ::-1, 0, 0], (2, 1, 0))[:, None]
        layer_inputs += [_pack_banded_fused(taps, W, c_slots, c_slots, COMPUTE_DTYPE),
                         lane_vec(layer["shift"], w5.shape[0])]

    wf = np.asarray(params["final"]["w"], np.float32)      # (Cout0, Ch, k, k, k)
    bf = np.asarray(params["final"]["b"], np.float32)
    k = wf.shape[2]
    taps = np.transpose(wf, (2, 3, 4, 1, 0)).reshape(k * k, k,
                                                     wf.shape[1], wf.shape[0])
    return {"layer_inputs": layer_inputs,
            "wf": _pack_banded_fused(taps, W, c_slots, c_slots, COMPUTE_DTYPE),
            "bf": lane_vec(bf, wf.shape[0])}


# ------------------------------ forward wrapper ----------------------------- #

def ablation_stconvs2s_r_inverted_forward(x, packed, *, num_layers, hidden_dim,
                                          kernel_size):
    """x: (N, C, T, H, W) PyTorch NCDHW layout; returns same shape/layout."""
    N, Cin, T, H, W = x.shape
    k = kernel_size
    p = k // 2
    assert k % 2 == 1, "time-flip folding requires an odd kernel_size"
    assert LANES % W == 0, "W must divide 128 for lane packing"
    c_slots = LANES // W
    assert hidden_dim == c_slots and Cin <= c_slots, \
        "lane packing needs W*hidden_dim == 128 and in_channels <= 128//W"
    Hstride = ((H + p + 15) // 16) * 16     # bf16-tile aligned rows per t step
    Mw = T * Hstride
    Rbuf = (T + 2 * p) * Hstride

    # Pack (w, c) into the lane axis (lane = w*c_slots + c, zero channel-slot
    # pad) and pad each t step to Hstride rows: every read/store in the kernel
    # is then a full-128-lane, tile-aligned slab.
    xt = jnp.transpose(x, (0, 2, 3, 4, 1))                 # (N, T, H, W, Cin)
    xt = jnp.pad(xt, ((0, 0), (0, 0), (0, Hstride - H), (0, 0),
                      (0, c_slots - Cin)))
    xp = xt.reshape(N, Mw, LANES).astype(COMPUTE_DTYPE)

    weight_inputs = packed["layer_inputs"] + [packed["wf"], packed["bf"]]
    in_specs = [pl.BlockSpec((1, Mw, LANES), lambda n: (n, 0, 0))]
    in_specs += [pl.BlockSpec(a.shape, lambda n: (0, 0)) for a in weight_inputs]
    # NOTE: at scaled-up shapes on v7x (64 MiB VMEM), add
    # pipeline_mode=pl.Buffered(1) on the constant-index weight specs above.

    flops = N * 2 * Mw * LANES * LANES * (2 * num_layers * k + k * k)
    bytes_accessed = int(xp.size * xp.dtype.itemsize
                         + sum(int(a.size) * a.dtype.itemsize
                               for a in weight_inputs)
                         + N * Mw * LANES * 4)

    out = pl.pallas_call(
        functools.partial(_fused_kernel, num_layers=num_layers, T=T, H=H, k=k,
                          Hstride=Hstride),
        out_shape=jax.ShapeDtypeStruct((N, Mw, LANES), jnp.float32),
        grid=(N,),
        in_specs=in_specs,
        out_specs=pl.BlockSpec((1, Mw, LANES), lambda n: (n, 0, 0)),
        scratch_shapes=[pltpu.VMEM((Rbuf, LANES), COMPUTE_DTYPE)],
        compiler_params=pltpu.CompilerParams(dimension_semantics=("parallel",)),
        cost_estimate=pl.CostEstimate(flops=int(flops), transcendentals=0,
                                      bytes_accessed=bytes_accessed),
    )(xp, *weight_inputs)

    out = out.reshape(N, T, Hstride, W, c_slots)[:, :, :H, :, :Cin]
    return jnp.transpose(out, (0, 4, 1, 2, 3))


# --------------------------- parameter creation ---------------------------- #

def _bn_affine(key, c):
    # Deterministic "running stats" BatchNorm3d (eval) folded into scale/shift.
    k1, k2, k3, k4 = jax.random.split(key, 4)
    gamma = 1.0 + 0.1 * jax.random.normal(k1, (c,), jnp.float32)
    beta = 0.1 * jax.random.normal(k2, (c,), jnp.float32)
    running_mean = 0.1 * jax.random.normal(k3, (c,), jnp.float32)
    running_var = 1.0 + 0.1 * jax.random.uniform(k4, (c,), jnp.float32)
    scale = gamma / jnp.sqrt(running_var + BN_EPS)
    shift = beta - running_mean * scale
    return scale, shift


def init_params(key, in_channels, hidden_dim, num_layers, kernel_size):
    k = kernel_size
    p = {"spatial": [], "temporal": []}
    cin = in_channels
    for _ in range(num_layers):   # SpatialBlock: Conv3d (1,k,k), no bias, + BN.
        key, kw_, kb_ = jax.random.split(key, 3)
        w = 0.1 * jax.random.normal(kw_, (hidden_dim, cin, 1, k, k), jnp.float32)
        scale, shift = _bn_affine(kb_, hidden_dim)
        p["spatial"].append({"w": w, "scale": scale, "shift": shift})
        cin = hidden_dim
    for _ in range(num_layers):   # TemporalReversedBlock: Conv3d (k,1,1), no bias, + BN.
        key, kw_, kb_ = jax.random.split(key, 3)
        w = 0.1 * jax.random.normal(kw_, (hidden_dim, hidden_dim, k, 1, 1), jnp.float32)
        scale, shift = _bn_affine(kb_, hidden_dim)
        p["temporal"].append({"w": w, "scale": scale, "shift": shift})
    key, kw_, kb_ = jax.random.split(key, 3)
    wf = 0.1 * jax.random.normal(kw_, (in_channels, hidden_dim, k, k, k), jnp.float32)
    bf = 0.1 * jax.random.normal(kb_, (in_channels,), jnp.float32)
    p["final"] = {"w": wf, "b": bf}
    return p


# --------------------------- plain-JAX reference --------------------------- #

def _conv3d_ref(x, w, pad):
    return jax.lax.conv_general_dilated(
        x, w, window_strides=(1, 1, 1), padding=pad,
        dimension_numbers=("NCDHW", "OIDHW", "NCDHW"),
        precision=jax.lax.Precision.HIGHEST)


def reference_forward(x, params):
    def affine(y, scale, shift):
        return y * scale[None, :, None, None, None] + shift[None, :, None, None, None]

    def pad_of(w):
        kt, kh, kw = w.shape[2:]
        return [(kt // 2, kt // 2), (kh // 2, kh // 2), (kw // 2, kw // 2)]

    x = x.astype(jnp.float32)
    for layer in params["spatial"]:
        x = jnp.maximum(affine(_conv3d_ref(x, layer["w"], pad_of(layer["w"])),
                               layer["scale"], layer["shift"]), 0.0)
    x = jnp.flip(x, axis=2)
    for layer in params["temporal"]:
        x = jnp.maximum(affine(_conv3d_ref(x, layer["w"], pad_of(layer["w"])),
                               layer["scale"], layer["shift"]), 0.0)
    x = jnp.flip(x, axis=2)
    wf, bf = params["final"]["w"], params["final"]["b"]
    x = _conv3d_ref(x, wf, pad_of(wf)) + bf[None, :, None, None, None]
    return x


# ---------------------------------- main ----------------------------------- #

if __name__ == "__main__":
    # input_size = (batch, channels, seq_len, height, width); step == seq_len so
    # the temporal generator branch of TemporalReversedBlock is never taken.
    # TODO(synk): temporal-generator path (only used when step > seq_len) not implemented.
    N, C, T, H, W = 2, 4, 5, 8, 8
    num_layers, hidden_dim, kernel_size, step = 2, 16, 3, 5

    key = jax.random.PRNGKey(0)
    kx, kp = jax.random.split(key)
    x = jax.random.normal(kx, (N, C, T, H, W), jnp.float32)
    params = init_params(kp, C, hidden_dim, num_layers, kernel_size)
    packed = pack_params(params, W)

    fwd = jax.jit(functools.partial(ablation_stconvs2s_r_inverted_forward,
                                    num_layers=num_layers, hidden_dim=hidden_dim,
                                    kernel_size=kernel_size))
    out = jax.block_until_ready(fwd(x, packed))

    assert out.shape == (N, C, T, H, W), out.shape

    ref = reference_forward(x, params)
    np.testing.assert_allclose(np.asarray(out), np.asarray(ref), rtol=5e-3, atol=5e-3)

    print("KERNEL_OK")
</pallas_src>

<mosaic_0001>
module attributes {stable_mosaic.version = 11 : i64} {
  func.func @_fused_kernel(%arg0: i32, %arg1: memref<1x80x128xf32, #tpu.memory_space<vmem>>, %arg2: memref<384x128xf32, #tpu.memory_space<vmem>>, %arg3: memref<1x128xf32, #tpu.memory_space<vmem>>, %arg4: memref<384x128xf32, #tpu.memory_space<vmem>>, %arg5: memref<1x128xf32, #tpu.memory_space<vmem>>, %arg6: memref<384x128xf32, #tpu.memory_space<vmem>>, %arg7: memref<1x128xf32, #tpu.memory_space<vmem>>, %arg8: memref<384x128xf32, #tpu.memory_space<vmem>>, %arg9: memref<1x128xf32, #tpu.memory_space<vmem>>, %arg10: memref<1152x128xf32, #tpu.memory_space<vmem>>, %arg11: memref<1x128xf32, #tpu.memory_space<vmem>>, %arg12: memref<1x80x128xf32, #tpu.memory_space<vmem>>, %arg13: memref<112x128xf32, #tpu.memory_space<vmem>>) attributes {dimension_semantics = [#tpu.dimension_semantics<parallel>], iteration_bounds = array<i64: 2>, scalar_prefetch = 0 : i64, scratch_operands = 1 : i64, tpu.core_type = #tpu.core_type<tc>, window_params = [{transform_indices = @transform_0, window_bounds = array<i64: 1, 80, 128>}, {pipeline_mode = #tpu.pipeline_mode<synchronous>, transform_indices = @transform_1, window_bounds = array<i64: 384, 128>}, {pipeline_mode = #tpu.pipeline_mode<synchronous>, transform_indices = @transform_2, window_bounds = array<i64: 1, 128>}, {pipeline_mode = #tpu.pipeline_mode<synchronous>, transform_indices = @transform_3, window_bounds = array<i64: 384, 128>}, {pipeline_mode = #tpu.pipeline_mode<synchronous>, transform_indices = @transform_4, window_bounds = array<i64: 1, 128>}, {pipeline_mode = #tpu.pipeline_mode<synchronous>, transform_indices = @transform_5, window_bounds = array<i64: 384, 128>}, {pipeline_mode = #tpu.pipeline_mode<synchronous>, transform_indices = @transform_6, window_bounds = array<i64: 1, 128>}, {pipeline_mode = #tpu.pipeline_mode<synchronous>, transform_indices = @transform_7, window_bounds = array<i64: 384, 128>}, {pipeline_mode = #tpu.pipeline_mode<synchronous>, transform_indices = @transform_8, window_bounds = array<i64: 1, 128>}, {pipeline_mode = #tpu.pipeline_mode<synchronous>, transform_indices = @transform_9, window_bounds = array<i64: 1152, 128>}, {pipeline_mode = #tpu.pipeline_mode<synchronous>, transform_indices = @transform_10, window_bounds = array<i64: 1, 128>}, {transform_indices = @transform_11, window_bounds = array<i64: 1, 80, 128>}]} {
    %cst = arith.constant 0.000000e+00 : f32
    %0 = vector.broadcast %cst : f32 to vector<16x128xf32>
    %c0 = arith.constant 0 : index
    %c0_0 = arith.constant 0 : index
    %1 = vector.load %arg13[%c0, %c0_0] : memref<112x128xf32, #tpu.memory_space<vmem>>, vector<16x128xf32>
    tpu.vector_store %arg13[%c0, %c0_0], %0 {strides = array<i32>} : memref<112x128xf32, #tpu.memory_space<vmem>>, vector<16x128xf32>,
    %cst_1 = arith.constant 0.000000e+00 : f32
    %2 = vector.broadcast %cst_1 : f32 to vector<16x128xf32>
    %c96 = arith.constant 96 : index
    %c0_2 = arith.constant 0 : index
    %3 = vector.load %arg13[%c96, %c0_2] : memref<112x128xf32, #tpu.memory_space<vmem>>, vector<16x128xf32>
    tpu.vector_store %arg13[%c96, %c0_2], %2 {strides = array<i32>} : memref<112x128xf32, #tpu.memory_space<vmem>>, vector<16x128xf32>,
    %4 = tpu.iota {dimensions = array<i32: 0>} : vector<80x128xi32>
    %c16_i32 = arith.constant 16 : i32
    %c0_i32 = arith.constant 0 : i32
    %5 = arith.cmpi eq, %c16_i32, %c0_i32 : i32
    %c1_i32 = arith.constant 1 : i32
    %6 = arith.select %5, %c1_i32, %c16_i32 : i32
    %7 = vector.broadcast %6 : i32 to vector<80x128xi32>
    %8 = arith.remsi %4, %7 : vector<80x128xi32>
    %c0_i32_3 = arith.constant 0 : i32
    %9 = vector.broadcast %c0_i32_3 : i32 to vector<80x128xi32>
    %10 = arith.cmpi ne, %8, %9 : vector<80x128xi32>
    %c0_i32_4 = arith.constant 0 : i32
    %11 = vector.broadcast %c0_i32_4 : i32 to vector<80x128xi32>
    %12 = arith.cmpi slt, %8, %11 : vector<80x128xi32>
    %c0_i32_5 = arith.constant 0 : i32
    %13 = arith.cmpi slt, %6, %c0_i32_5 : i32
    %14 = vector.broadcast %13 : i1 to vector<80x128xi1>
    %15 = vector.broadcast %14 : vector<80x128xi1> to vector<80x128xi1>
    %16 = arith.xori %12, %15 : vector<80x128xi1>
    %17 = arith.andi %16, %10 : vector<80x128xi1>
    %18 = vector.broadcast %6 : i32 to vector<80x128xi32>
    %19 = arith.addi %8, %18 : vector<80x128xi32>
    %20 = arith.select %17, %19, %8 : vector<80x128xi1>, vector<80x128xi32>
    %c8_i32 = arith.constant 8 : i32
    %21 = vector.broadcast %c8_i32 : i32 to vector<80x128xi32>
    %22 = arith.cmpi slt, %20, %21 : vector<80x128xi32>
    %c0_6 = arith.constant 0 : index
    %c0_7 = arith.constant 0 : index
    %c0_8 = arith.constant 0 : index
    %23 = vector.load %arg1[%c0_6, %c0_7, %c0_8] : memref<1x80x128xf32, #tpu.memory_space<vmem>>, vector<1x80x128xf32>
    %24 = vector.shape_cast %23 : vector<1x80x128xf32> to vector<80x128xf32>
    %c1_i32_9 = arith.constant 1 : i32
    %25 = tpu.dynamic_rotate %24 by %c1_i32_9 dim 0 : vector<80x128xf32>, i32 -> vector<80x128xf32>
    %c79_i32 = arith.constant 79 : i32
    %26 = tpu.dynamic_rotate %24 by %c79_i32 dim 0 : vector<80x128xf32>, i32 -> vector<80x128xf32>
    %27 = tpu.concatenate %25, %24, %26 in 1 : vector<80x128xf32>, vector<80x128xf32>, vector<80x128xf32> -> vector<80x384xf32>
    %c0_10 = arith.constant 0 : index
    %c0_11 = arith.constant 0 : index
    %28 = vector.load %arg2[%c0_10, %c0_11] : memref<384x128xf32, #tpu.memory_space<vmem>>, vector<384x128xf32>
    %c0_12 = arith.constant 0 : index
    %c0_13 = arith.constant 0 : index
    %29 = vector.load %arg3[%c0_12, %c0_13] : memref<1x128xf32, #tpu.memory_space<vmem>>, vector<1x128xf32>
    %cst_14 = arith.constant dense<0.000000e+00> : vector<80x128xf32>
    %30 = tpu.matmul %27, %28, %cst_14 {dimension_numbers = #tpu.dot_dimension_numbers<[1], [0], [0], [1], [0, 0, 1, 1], [], []>} : vector<80x384xf32>, vector<384x128xf32>, vector<80x128xf32> -> vector<80x128xf32>
    %31 = vector.broadcast %29 : vector<1x128xf32> to vector<80x128xf32>
    %32 = arith.addf %30, %31 : vector<80x128xf32>
    %cst_15 = arith.constant 0.000000e+00 : f32
    %33 = vector.broadcast %cst_15 : f32 to vector<80x128xf32>
    %34 = arith.maximumf %32, %33 : vector<80x128xf32>
    %cst_16 = arith.constant 0.000000e+00 : f32
    %35 = vector.broadcast %cst_16 : f32 to vector<80x128xf32>
    %36 = arith.select %22, %34, %35 : vector<80x128xi1>, vector<80x128xf32>
    %c16 = arith.constant 16 : index
    %c0_17 = arith.constant 0 : index
    %37 = vector.load %arg13[%c16, %c0_17] : memref<112x128xf32, #tpu.memory_space<vmem>>, vector<80x128xf32>
    tpu.vector_store %arg13[%c16, %c0_17], %36 {strides = array<i32>} : memref<112x128xf32, #tpu.memory_space<vmem>>, vector<80x128xf32>,
    %c16_18 = arith.constant 16 : index
    %c0_19 = arith.constant 0 : index
    %38 = vector.load %arg13[%c16_18, %c0_19] : memref<112x128xf32, #tpu.memory_space<vmem>>, vector<80x128xf32>
    %c1_i32_20 = arith.constant 1 : i32
    %39 = tpu.dynamic_rotate %38 by %c1_i32_20 dim 0 : vector<80x128xf32>, i32 -> vector<80x128xf32>
    %c79_i32_21 = arith.constant 79 : i32
    %40 = tpu.dynamic_rotate %38 by %c79_i32_21 dim 0 : vector<80x128xf32>, i32 -> vector<80x128xf32>
    %41 = tpu.concatenate %39, %38, %40 in 1 : vector<80x128xf32>, vector<80x128xf32>, vector<80x128xf32> -> vector<80x384xf32>
    %c0_22 = arith.constant 0 : index
    %c0_23 = arith.constant 0 : index
    %42 = vector.load %arg4[%c0_22, %c0_23] : memref<384x128xf32, #tpu.memory_space<vmem>>, vector<384x128xf32>
    %c0_24 = arith.constant 0 : index
    %c0_25 = arith.constant 0 : index
    %43 = vector.load %arg5[%c0_24, %c0_25] : memref<1x128xf32, #tpu.memory_space<vmem>>, vector<1x128xf32>
    %cst_26 = arith.constant dense<0.000000e+00> : vector<80x128xf32>
    %44 = tpu.matmul %41, %42, %cst_26 {dimension_numbers = #tpu.dot_dimension_numbers<[1], [0], [0], [1], [0, 0, 1, 1], [], []>} : vector<80x384xf32>, vector<384x128xf32>, vector<80x128xf32> -> vector<80x128xf32>
    %45 = vector.broadcast %43 : vector<1x128xf32> to vector<80x128xf32>
    %46 = arith.addf %44, %45 : vector<80x128xf32>
    %cst_27 = arith.constant 0.000000e+00 : f32
    %47 = vector.broadcast %cst_27 : f32 to vector<80x128xf32>
    %48 = arith.maximumf %46, %47 : vector<80x128xf32>
    %cst_28 = arith.constant 0.000000e+00 : f32
    %49 = vector.broadcast %cst_28 : f32 to vector<80x128xf32>
    %50 = arith.select %22, %48, %49 : vector<80x128xi1>, vector<80x128xf32>
    %c16_29 = arith.constant 16 : index
    %c0_30 = arith.constant 0 : index
    %51 = vector.load %arg13[%c16_29, %c0_30] : memref<112x128xf32, #tpu.memory_space<vmem>>, vector<80x128xf32>
    tpu.vector_store %arg13[%c16_29, %c0_30], %50 {strides = array<i32>} : memref<112x128xf32, #tpu.memory_space<vmem>>, vector<80x128xf32>,
    %c0_31 = arith.constant 0 : index
    %c0_32 = arith.constant 0 : index
    %52 = vector.load %arg13[%c0_31, %c0_32] : memref<112x128xf32, #tpu.memory_space<vmem>>, vector<80x128xf32>
    %c16_33 = arith.constant 16 : index
    %c0_34 = arith.constant 0 : index
    %53 = vector.load %arg13[%c16_33, %c0_34] : memref<112x128xf32, #tpu.memory_space<vmem>>, vector<80x128xf32>
    %c32 = arith.constant 32 : index
    %c0_35 = arith.constant 0 : index
    %54 = vector.load %arg13[%c32, %c0_35] : memref<112x128xf32, #tpu.memory_space<vmem>>, vector<80x128xf32>
    %55 = tpu.concatenate %52, %53, %54 in 1 : vector<80x128xf32>, vector<80x128xf32>, vector<80x128xf32> -> vector<80x384xf32>
    %c0_36 = arith.constant 0 : index
    %c0_37 = arith.constant 0 : index
    %56 = vector.load %arg6[%c0_36, %c0_37] : memref<384x128xf32, #tpu.memory_space<vmem>>, vector<384x128xf32>
    %c0_38 = arith.constant 0 : index
    %c0_39 = arith.constant 0 : index
    %57 = vector.load %arg7[%c0_38, %c0_39] : memref<1x128xf32, #tpu.memory_space<vmem>>, vector<1x128xf32>
    %cst_40 = arith.constant dense<0.000000e+00> : vector<80x128xf32>
    %58 = tpu.matmul %55, %56, %cst_40 {dimension_numbers = #tpu.dot_dimension_numbers<[1], [0], [0], [1], [0, 0, 1, 1], [], []>} : vector<80x384xf32>, vector<384x128xf32>, vector<80x128xf32> -> vector<80x128xf32>
    %59 = vector.broadcast %57 : vector<1x128xf32> to vector<80x128xf32>
    %60 = arith.addf %58, %59 : vector<80x128xf32>
    %cst_41 = arith.constant 0.000000e+00 : f32
    %61 = vector.broadcast %cst_41 : f32 to vector<80x128xf32>
    %62 = arith.maximumf %60, %61 : vector<80x128xf32>
    %cst_42 = arith.constant 0.000000e+00 : f32
    %63 = vector.broadcast %cst_42 : f32 to vector<80x128xf32>
    %64 = arith.select %22, %62, %63 : vector<80x128xi1>, vector<80x128xf32>
    %c16_43 = arith.constant 16 : index
    %c0_44 = arith.constant 0 : index
    %65 = vector.load %arg13[%c16_43, %c0_44] : memref<112x128xf32, #tpu.memory_space<vmem>>, vector<80x128xf32>
    tpu.vector_store %arg13[%c16_43, %c0_44], %64 {strides = array<i32>} : memref<112x128xf32, #tpu.memory_space<vmem>>, vector<80x128xf32>,
    %c0_45 = arith.constant 0 : index
    %c0_46 = arith.constant 0 : index
    %66 = vector.load %arg13[%c0_45, %c0_46] : memref<112x128xf32, #tpu.memory_space<vmem>>, vector<80x128xf32>
    %c16_47 = arith.constant 16 : index
    %c0_48 = arith.constant 0 : index
    %67 = vector.load %arg13[%c16_47, %c0_48] : memref<112x128xf32, #tpu.memory_space<vmem>>, vector<80x128xf32>
    %c32_49 = arith.constant 32 : index
    %c0_50 = arith.constant 0 : index
    %68 = vector.load %arg13[%c32_49, %c0_50] : memref<112x128xf32, #tpu.memory_space<vmem>>, vector<80x128xf32>
    %69 = tpu.concatenate %66, %67, %68 in 1 : vector<80x128xf32>, vector<80x128xf32>, vector<80x128xf32> -> vector<80x384xf32>
    %c0_51 = arith.constant 0 : index
    %c0_52 = arith.constant 0 : index
    %70 = vector.load %arg8[%c0_51, %c0_52] : memref<384x128xf32, #tpu.memory_space<vmem>>, vector<384x128xf32>
    %c0_53 = arith.constant 0 : index
    %c0_54 = arith.constant 0 : index
    %71 = vector.load %arg9[%c0_53, %c0_54] : memref<1x128xf32, #tpu.memory_space<vmem>>, vector<1x128xf32>
    %cst_55 = arith.constant dense<0.000000e+00> : vector<80x128xf32>
    %72 = tpu.matmul %69, %70, %cst_55 {dimension_numbers = #tpu.dot_dimension_numbers<[1], [0], [0], [1], [0, 0, 1, 1], [], []>} : vector<80x384xf32>, vector<384x128xf32>, vector<80x128xf32> -> vector<80x128xf32>
    %73 = vector.broadcast %71 : vector<1x128xf32> to vector<80x128xf32>
    %74 = arith.addf %72, %73 : vector<80x128xf32>
    %cst_56 = arith.constant 0.000000e+00 : f32
    %75 = vector.broadcast %cst_56 : f32 to vector<80x128xf32>
    %76 = arith.maximumf %74, %75 : vector<80x128xf32>
    %cst_57 = arith.constant 0.000000e+00 : f32
    %77 = vector.broadcast %cst_57 : f32 to vector<80x128xf32>
    %78 = arith.select %22, %76, %77 : vector<80x128xi1>, vector<80x128xf32>
    %c16_58 = arith.constant 16 : index
    %c0_59 = arith.constant 0 : index
    %79 = vector.load %arg13[%c16_58, %c0_59] : memref<112x128xf32, #tpu.memory_space<vmem>>, vector<80x128xf32>
    tpu.vector_store %arg13[%c16_58, %c0_59], %78 {strides = array<i32>} : memref<112x128xf32, #tpu.memory_space<vmem>>, vector<80x128xf32>,
    %c0_60 = arith.constant 0 : index
    %c0_61 = arith.constant 0 : index
    %80 = vector.load %arg13[%c0_60, %c0_61] : memref<112x128xf32, #tpu.memory_space<vmem>>, vector<80x128xf32>
    %c1_i32_62 = arith.constant 1 : i32
    %81 = tpu.dynamic_rotate %80 by %c1_i32_62 dim 0 : vector<80x128xf32>, i32 -> vector<80x128xf32>
    %c79_i32_63 = arith.constant 79 : i32
    %82 = tpu.dynamic_rotate %80 by %c79_i32_63 dim 0 : vector<80x128xf32>, i32 -> vector<80x128xf32>
    %83 = tpu.concatenate %81, %80, %82 in 1 : vector<80x128xf32>, vector<80x128xf32>, vector<80x128xf32> -> vector<80x384xf32>
    %c0_64 = arith.constant 0 : index
    %c0_65 = arith.constant 0 : index
    %84 = vector.load %arg10[%c0_64, %c0_65] : memref<1152x128xf32, #tpu.memory_space<vmem>>, vector<384x128xf32>
    %cst_66 = arith.constant dense<0.000000e+00> : vector<80x128xf32>
    %85 = tpu.matmul %83, %84, %cst_66 {dimension_numbers = #tpu.dot_dimension_numbers<[1], [0], [0], [1], [0, 0, 1, 1], [], []>} : vector<80x384xf32>, vector<384x128xf32>, vector<80x128xf32> -> vector<80x128xf32>
    %c16_67 = arith.constant 16 : index
    %c0_68 = arith.constant 0 : index
    %86 = vector.load %arg13[%c16_67, %c0_68] : memref<112x128xf32, #tpu.memory_space<vmem>>, vector<80x128xf32>
    %c1_i32_69 = arith.constant 1 : i32
    %87 = tpu.dynamic_rotate %86 by %c1_i32_69 dim 0 : vector<80x128xf32>, i32 -> vector<80x128xf32>
    %c79_i32_70 = arith.constant 79 : i32
    %88 = tpu.dynamic_rotate %86 by %c79_i32_70 dim 0 : vector<80x128xf32>, i32 -> vector<80x128xf32>
    %89 = tpu.concatenate %87, %86, %88 in 1 : vector<80x128xf32>, vector<80x128xf32>, vector<80x128xf32> -> vector<80x384xf32>
    %c384 = arith.constant 384 : index
    %c0_71 = arith.constant 0 : index
    %90 = vector.load %arg10[%c384, %c0_71] : memref<1152x128xf32, #tpu.memory_space<vmem>>, vector<384x128xf32>
    %cst_72 = arith.constant dense<0.000000e+00> : vector<80x128xf32>
    %91 = tpu.matmul %89, %90, %cst_72 {dimension_numbers = #tpu.dot_dimension_numbers<[1], [0], [0], [1], [0, 0, 1, 1], [], []>} : vector<80x384xf32>, vector<384x128xf32>, vector<80x128xf32> -> vector<80x128xf32>
    %92 = arith.addf %85, %91 : vector<80x128xf32>
    %c32_73 = arith.constant 32 : index
    %c0_74 = arith.constant 0 : index
    %93 = vector.load %arg13[%c32_73, %c0_74] : memref<112x128xf32, #tpu.memory_space<vmem>>, vector<80x128xf32>
    %c1_i32_75 = arith.constant 1 : i32
    %94 = tpu.dynamic_rotate %93 by %c1_i32_75 dim 0 : vector<80x128xf32>, i32 -> vector<80x128xf32>
    %c79_i32_76 = arith.constant 79 : i32
    %95 = tpu.dynamic_rotate %93 by %c79_i32_76 dim 0 : vector<80x128xf32>, i32 -> vector<80x128xf32>
    %96 = tpu.concatenate %94, %93, %95 in 1 : vector<80x128xf32>, vector<80x128xf32>, vector<80x128xf32> -> vector<80x384xf32>
    %c768 = arith.constant 768 : index
    %c0_77 = arith.constant 0 : index
    %97 = vector.load %arg10[%c768, %c0_77] : memref<1152x128xf32, #tpu.memory_space<vmem>>, vector<384x128xf32>
    %cst_78 = arith.constant dense<0.000000e+00> : vector<80x128xf32>
    %98 = tpu.matmul %96, %97, %cst_78 {dimension_numbers = #tpu.dot_dimension_numbers<[1], [0], [0], [1], [0, 0, 1, 1], [], []>} : vector<80x384xf32>, vector<384x128xf32>, vector<80x128xf32> -> vector<80x128xf32>
    %99 = arith.addf %92, %98 : vector<80x128xf32>
    %c0_79 = arith.constant 0 : index
    %c0_80 = arith.constant 0 : index
    %100 = vector.load %arg11[%c0_79, %c0_80] : memref<1x128xf32, #tpu.memory_space<vmem>>, vector<1x128xf32>
    %101 = vector.broadcast %100 : vector<1x128xf32> to vector<80x128xf32>
    %102 = arith.addf %99, %101 : vector<80x128xf32>
    %103 = vector.shape_cast %102 : vector<80x128xf32> to vector<1x80x128xf32>
    %c0_81 = arith.constant 0 : index
    %c0_82 = arith.constant 0 : index
    %c0_83 = arith.constant 0 : index
    %104 = vector.load %arg12[%c0_81, %c0_82, %c0_83] : memref<1x80x128xf32, #tpu.memory_space<vmem>>, vector<1x80x128xf32>
    tpu.vector_store %arg12[%c0_81, %c0_82, %c0_83], %103 {strides = array<i32>} : memref<1x80x128xf32, #tpu.memory_space<vmem>>, vector<1x80x128xf32>,
    return
  }
  func.func @transform_0(%arg0: i32) -> (i32, i32, i32) {
    %c0_i32 = arith.constant 0 : i32
    %c0_i32_0 = arith.constant 0 : i32
    %c0_i32_1 = arith.constant 0 : i32
    return %arg0, %c0_i32, %c0_i32_0 : i32, i32, i32
  }
  func.func @transform_1(%arg0: i32) -> (i32, i32) {
    %c0_i32 = arith.constant 0 : i32
    %c0_i32_0 = arith.constant 0 : i32
    %c0_i32_1 = arith.constant 0 : i32
    return %c0_i32, %c0_i32_0 : i32, i32
  }
  func.func @transform_2(%arg0: i32) -> (i32, i32) {
    %c0_i32 = arith.constant 0 : i32
    %c0_i32_0 = arith.constant 0 : i32
    %c0_i32_1 = arith.constant 0 : i32
    return %c0_i32, %c0_i32_0 : i32, i32
  }
  func.func @transform_3(%arg0: i32) -> (i32, i32) {
    %c0_i32 = arith.constant 0 : i32
    %c0_i32_0 = arith.constant 0 : i32
    %c0_i32_1 = arith.constant 0 : i32
    return %c0_i32, %c0_i32_0 : i32, i32
  }
  func.func @transform_4(%arg0: i32) -> (i32, i32) {
    %c0_i32 = arith.constant 0 : i32
    %c0_i32_0 = arith.constant 0 : i32
    %c0_i32_1 = arith.constant 0 : i32
    return %c0_i32, %c0_i32_0 : i32, i32
  }
  func.func @transform_5(%arg0: i32) -> (i32, i32) {
    %c0_i32 = arith.constant 0 : i32
    %c0_i32_0 = arith.constant 0 : i32
    %c0_i32_1 = arith.constant 0 : i32
    return %c0_i32, %c0_i32_0 : i32, i32
  }
  func.func @transform_6(%arg0: i32) -> (i32, i32) {
    %c0_i32 = arith.constant 0 : i32
    %c0_i32_0 = arith.constant 0 : i32
    %c0_i32_1 = arith.constant 0 : i32
    return %c0_i32, %c0_i32_0 : i32, i32
  }
  func.func @transform_7(%arg0: i32) -> (i32, i32) {
    %c0_i32 = arith.constant 0 : i32
    %c0_i32_0 = arith.constant 0 : i32
    %c0_i32_1 = arith.constant 0 : i32
    return %c0_i32, %c0_i32_0 : i32, i32
  }
  func.func @transform_8(%arg0: i32) -> (i32, i32) {
    %c0_i32 = arith.constant 0 : i32
    %c0_i32_0 = arith.constant 0 : i32
    %c0_i32_1 = arith.constant 0 : i32
    return %c0_i32, %c0_i32_0 : i32, i32
  }
  func.func @transform_9(%arg0: i32) -> (i32, i32) {
    %c0_i32 = arith.constant 0 : i32
    %c0_i32_0 = arith.constant 0 : i32
    %c0_i32_1 = arith.constant 0 : i32
    return %c0_i32, %c0_i32_0 : i32, i32
  }
  func.func @transform_10(%arg0: i32) -> (i32, i32) {
    %c0_i32 = arith.constant 0 : i32
    %c0_i32_0 = arith.constant 0 : i32
    %c0_i32_1 = arith.constant 0 : i32
    return %c0_i32, %c0_i32_0 : i32, i32
  }
  func.func @transform_11(%arg0: i32) -> (i32, i32, i32) {
    %c0_i32 = arith.constant 0 : i32
    %c0_i32_0 = arith.constant 0 : i32
    %c0_i32_1 = arith.constant 0 : i32
    return %arg0, %c0_i32, %c0_i32_0 : i32, i32, i32
  }
}

</mosaic_0001>

<bundles_post_ra>
// kernel: ablation_stconvs2s_r_inverted_forward.1
= control target key start
LH: loop header
LB: loop body
LE: loop exit
PB: predicated region body
PF: predicated region fallthrough
CT: control target
= control target key end

     0   :  { %s4512_s17 = smov 0   ;;  %s6111_s0 = inlined_call_operand.vmem [shape: f32[2,80,128], index: 0, kind: input, shape index: {}]   ;;  %s6112_s1 = inlined_call_operand.vmem [shape: f32[384,128], index: 1, kind: input, shape index: {}]   ;;  %s6113_s2 = inlined_call_operand.vmem [shape: f32[1,128], index: 2, kind: input, shape index: {}]   ;;  %s6114_s3 = inlined_call_operand.vmem [shape: f32[384,128], index: 3, kind: input, shape index: {}]   ;;  %s6115_s4 = inlined_call_operand.vmem [shape: f32[1,128], index: 4, kind: input, shape index: {}]   ;;  %s6116_s5 = inlined_call_operand.vmem [shape: f32[384,128], index: 5, kind: input, shape index: {}]   ;;  %s6117_s6 = inlined_call_operand.vmem [shape: f32[1,128], index: 6, kind: input, shape index: {}]   ;;  %s6118_s7 = inlined_call_operand.vmem [shape: f32[384,128], index: 7, kind: input, shape index: {}]   ;;  %s6119_s8 = inlined_call_operand.vmem [shape: f32[1,128], index: 8, kind: input, shape index: {}]   ;;  %s6120_s9 = inlined_call_operand.vmem [shape: f32[1152,128], index: 9, kind: input, shape index: {}]   ;;  %s6121_s10 = inlined_call_operand.vmem [shape: f32[1,128], index: 10, kind: input, shape index: {}]   ;;  %s6122_s11 = inlined_call_operand.vmem [shape: f32[2,80,128], index: 11, kind: output, shape index: {}]  }
   0x1 LB: > { %s2976_s18 = sadd.s32 4294967295, %s4449_s17   ;;  %p2980_p0 = scmp.ge.s32.totalorder %s4449_s17, 1  ;;  %s4449_s17 = sphi %s4512_s17, %s21_s17  }
   0x2   : > { %p337_p1 = scmp.lt.s32.totalorder %s4449_s17, 3 }
   0x4   : > { %p338_p2 = pnand %p2980_p0, %p337_p1 }
   0x5   : > { %v600_v0 = vld [vmem:[%s6112_s1 + $0x80] sm:$0xff] (!%p338_p2)  ;;  %v601_v1 = vld [vmem:[%s6112_s1 + $0x88] sm:$0xff] (!%p338_p2)  ;;  %p4529_p3 = scmp.lt.s32.totalorder (!%p338_p2), %s2976_s18, 1  ;;  %v602_v5 = vld [vmem:[%s6112_s1 + $0x90] sm:$0xff] (!%p338_p2)  ;;  %v391_v36 = vlaneseq (!%p338_p2) }
   0x6   : > { %341 = sbr.rel (%p338_p2) target bundleno = 1262 (0x4ee), region = 64  ;;  %v584_v2 = vld [vmem:[%s6112_s1] sm:$0xff] (!%p338_p2)  ;;  %v3935_v3 = vpack.c.bf16 (!%p338_p2), %v601_v1, %v600_v0  ;;  %v585_v4 = vld [vmem:[%s6112_s1 + $0x8] sm:$0xff] (!%p338_p2)  ;;  %v603_v6 = vld [vmem:[%s6112_s1 + $0x98] sm:$0xff] (!%p338_p2) }
   0x7   : > { %v3937_v7 = vpack.c.bf16 (!%p338_p2), %v585_v4, %v584_v2  ;;  %v3939_v8 = vpack.c.bf16 (!%p338_p2), %v603_v6, %v602_v5  ;;  %v616_v9 = vld [vmem:[%s6112_s1 + $0x100] sm:$0xff] (!%p338_p2)  ;;  %v617_v10 = vld [vmem:[%s6112_s1 + $0x108] sm:$0xff] (!%p338_p2)  ;;  %v586_v11 = vld [vmem:[%s6112_s1 + $0x10] sm:$0xff] (!%p338_p2)  ;;  %v4632_v46 = vshrl.u32 (!%p338_p2), %v391_v36, 7 }
   0x8   : > { %3936 = vmatprep.subr.bf16.mxu0 (!%p338_p2), %v3935_v3  ;;  %v3967_v12 = vpack.c.bf16 (!%p338_p2), %v617_v10, %v616_v9  ;;  %v587_v13 = vld [vmem:[%s6112_s1 + $0x18] sm:$0xff] (!%p338_p2)  ;;  %v604_v14 = vld [vmem:[%s6112_s1 + $0xa0] sm:$0xff] (!%p338_p2)  ;;  %v605_v15 = vld [vmem:[%s6112_s1 + $0xa8] sm:$0xff] (!%p338_p2) }
   0x9   : > { %3938 = vmatpush3.bf16.msra.mxu0 (!%p338_p2), %v3937_v7  ;;  %v3941_v16 = vpack.c.bf16 (!%p338_p2), %v587_v13, %v586_v11  ;;  %v618_v17 = vld [vmem:[%s6112_s1 + $0x110] sm:$0xff] (!%p338_p2)  ;;  %v619_v18 = vld [vmem:[%s6112_s1 + $0x118] sm:$0xff] (!%p338_p2)  ;;  %v3943_v19 = vpack.c.bf16 (!%p338_p2), %v605_v15, %v604_v14  ;;  %v588_v21 = vld [vmem:[%s6112_s1 + $0x20] sm:$0xff] (!%p338_p2)  ;;  %vm573_vm0 = vcmp.lt.s32.totalorder (!%p338_p2), %v4632_v46, 7  ;;  %vm552_vm1 = vcmp.lt.s32.totalorder (!%p338_p2), %v4632_v46, 1 }
   0xa   : > { %3940 = vmatprep.subr.bf16.mxu0 (!%p338_p2), %v3939_v8  ;;  %3968 = vmatprep.subr.bf16.mxu1 (!%p338_p2), %v3967_v12  ;;  %v3971_v20 = vpack.c.bf16 (!%p338_p2), %v619_v18, %v618_v17  ;;  %v589_v22 = vld [vmem:[%s6112_s1 + $0x28] sm:$0xff] (!%p338_p2)  ;;  %v606_v23 = vld [vmem:[%s6112_s1 + $0xb0] sm:$0xff] (!%p338_p2)  ;;  %v607_v24 = vld [vmem:[%s6112_s1 + $0xb8] sm:$0xff] (!%p338_p2) }
   0xb   : > { %3970 = vmatpush3.bf16.msra.mxu1 (!%p338_p2), %v3967_v12  ;;  %v620_v25 = vld [vmem:[%s6112_s1 + $0x120] sm:$0xff] (!%p338_p2)  ;;  %v621_v26 = vld [vmem:[%s6112_s1 + $0x128] sm:$0xff] (!%p338_p2)  ;;  %v3945_v28 = vpack.c.bf16 (!%p338_p2), %v589_v22, %v588_v21  ;;  %v622_v29 = vld [vmem:[%s6112_s1 + $0x130] sm:$0xff] (!%p338_p2)  ;;  %v3947_v31 = vpack.c.bf16 (!%p338_p2), %v607_v24, %v606_v23 }
   0xc   : > { %3972 = vmatprep.subr.bf16.mxu1 (!%p338_p2), %v3971_v20  ;;  %v3975_v27 = vpack.c.bf16 (!%p338_p2), %v621_v26, %v620_v25  ;;  %v623_v30 = vld [vmem:[%s6112_s1 + $0x138] sm:$0xff] (!%p338_p2)  ;;  %v590_v32 = vld [vmem:[%s6112_s1 + $0x30] sm:$0xff] (!%p338_p2)  ;;  %v608_v34 = vld [vmem:[%s6112_s1 + $0xc0] sm:$0xff] (!%p338_p2) }
   0xd   : > { %s6125_s18 = smov (!%p4529_p3, %s2976_s18), 1  ;;  %3942 = vmatpush3.bf16.msra.mxu0 %v3941_v16  ;;  %v591_v33 = vld [vmem:[%s6112_s1 + $0x38] sm:$0xff]  ;;  %v609_v35 = vld [vmem:[%s6112_s1 + $0xc8] sm:$0xff]  ;;  %v3979_v37 = vpack.c.bf16 %v623_v30, %v622_v29  ;;  %v624_v39 = vld [vmem:[%s6112_s1 + $0x140] sm:$0xff] }
   0xe   : > { %s4433_s12 = smul.u32 80, %s6125_s18  ;;  %3944 = vmatprep.subr.bf16.mxu0 %v3943_v19  ;;  %v3949_v38 = vpack.c.bf16 %v591_v33, %v590_v32  ;;  %v625_v40 = vld [vmem:[%s6112_s1 + $0x148] sm:$0xff]  ;;  %v3951_v41 = vpack.c.bf16 %v609_v35, %v608_v34  ;;  %v592_v42 = vld [vmem:[%s6112_s1 + $0x40] sm:$0xff]  ;;  %v610_v44 = vld [vmem:[%s6112_s1 + $0xd0] sm:$0xff] }
   0xf   : > { %3974 = vmatpush3.bf16.msra.mxu1 %v3971_v20  ;;  %v593_v43 = vld [vmem:[%s6112_s1 + $0x48] sm:$0xff]  ;;  %v611_v45 = vld [vmem:[%s6112_s1 + $0xd8] sm:$0xff]  ;;  %v3983_v47 = vpack.c.bf16 %v625_v40, %v624_v39  ;;  %v626_v50 = vld [vmem:[%s6112_s1 + $0x150] sm:$0xff] }
  0x10   : > { %3976 = vmatprep.subr.bf16.mxu1 %v3975_v27  ;;  %s4618_s29 = scalar_lea.vmem %s6111_s0, %s4433_s12  ;;  %v3953_v49 = vpack.c.bf16 %v593_v43, %v592_v42  ;;  %v627_v51 = vld [vmem:[%s6112_s1 + $0x158] sm:$0xff]  ;;  %v3955_v54 = vpack.c.bf16 %v611_v45, %v610_v44  ;;  %v594_v55 = vld [vmem:[%s6112_s1 + $0x50] sm:$0xff]  ;;  %v612_v58 = vld [vmem:[%s6112_s1 + $0xe0] sm:$0xff]  ;;  %s6084_s21 = scalar_lea.vmem %s6122_s11, %s4433_s12 }
  0x11   : > { %3946 = vmatpush3.bf16.msra.mxu0 %v3945_v28  ;;  %v4635_v48 = vld [vmem:[%s4618_s29] sm:$0xff]  ;;  %v4646_v53 = vld [vmem:[%s4618_s29 + $0x8] sm:$0xff]  ;;  %v595_v56 = vld [vmem:[%s6112_s1 + $0x58] sm:$0xff]  ;;  %v3987_v60 = vpack.c.bf16 %v627_v51, %v626_v50 }
  0x12   : > { %3948 = vmatprep.subr.bf16.mxu0 %v3947_v31  ;;  %v563_v52 = vrot.slane %v4635_v48, 1  ;;  %703 = vmatprep.mubr.f32.mxu0 %v4635_v48  ;;  %v564_v57 = vrot.slane %v4646_v53, 1  ;;  %v613_v59 = vld [vmem:[%s6112_s1 + $0xe8] sm:$0xff]  ;;  %v3957_v62 = vpack.c.bf16 %v595_v56, %v594_v55  ;;  %v628_v63 = vld [vmem:[%s6112_s1 + $0x160] sm:$0xff]  ;;  %v614_v4 = vld [vmem:[%s6112_s1 + $0xf0] sm:$0xff]  ;;  %v542_v19 = vrot.slane %v4635_v48, 7 }
  0x13   : > { %3978 = vmatpush3.bf16.msra.mxu1 %v3975_v27  ;;  %v629_v0 = vld [vmem:[%s6112_s1 + $0x168] sm:$0xff]  ;;  %v3959_v1 = vpack.c.bf16 %v613_v59, %v612_v58  ;;  %v596_v2 = vld [vmem:[%s6112_s1 + $0x60] sm:$0xff]  ;;  %v615_v5 = vld [vmem:[%s6112_s1 + $0xf8] sm:$0xff]  ;;  %v543_v34 = vrot.slane %v4646_v53, 7 }
  0x14   : > { %3980 = vmatprep.subr.bf16.mxu1 %v3979_v37  ;;  %v582_v61 = vsel %vm573_vm0, %v563_v52, %v564_v57  ;;  %v597_v3 = vld [vmem:[%s6112_s1 + $0x68] sm:$0xff]  ;;  %v3991_v6 = vpack.c.bf16 %v629_v0, %v628_v63  ;;  %v630_v8 = vld [vmem:[%s6112_s1 + $0x170] sm:$0xff]  ;;  %v631_v9 = vld [vmem:[%s6112_s1 + $0x178] sm:$0xff]  ;;  %v3963_v10 = vpack.c.bf16 %v615_v5, %v614_v4 }
  0x15   : > { %3950 = vmatpush3.bf16.msra.mxu0 %v3949_v38  ;;  %3638 = vmatprep.mubr.f32.mxu1 %v582_v61  ;;  %v3961_v7 = vpack.c.bf16 %v597_v3, %v596_v2  ;;  %v598_v11 = vld [vmem:[%s6112_s1 + $0x70] sm:$0xff]  ;;  %v599_v12 = vld [vmem:[%s6112_s1 + $0x78] sm:$0xff]  ;;  %v4699_v13 = vld [vmem:[%s4618_s29 + $0x48] sm:$0xff]  ;;  %v3995_v16 = vpack.c.bf16 %v631_v9, %v630_v8 }
  0x16   : > { %3952 = vmatprep.subr.bf16.mxu0 %v3951_v41  ;;  %v981_v14 = vld [vmem:[%s6114_s3 + $0x100] sm:$0xff]  ;;  %v982_v15 = vld [vmem:[%s6114_s3 + $0x108] sm:$0xff]  ;;  %v4708_v17 = vld [vmem:[%s4618_s29 + $0x10] sm:$0xff]  ;;  %v3965_v18 = vpack.c.bf16 %v599_v12, %v598_v11  ;;  %v551_v20 = vrot.slane %v4699_v13, 7  ;;  %v572_v12 = vrot.slane %v4699_v13, 1 }
  0x17   : > { %3982 = vmatpush3.bf16.msra.mxu1 %v3979_v37  ;;  %v4713_v21 = vld [vmem:[%s4618_s29 + $0x18] sm:$0xff]  ;;  %v965_v22 = vld [vmem:[%s6114_s3 + $0x80] sm:$0xff]  ;;  %v966_v23 = vld [vmem:[%s6114_s3 + $0x88] sm:$0xff]  ;;  %v4031_v24 = vpack.c.bf16 %v982_v15, %v981_v14  ;;  %v565_v25 = vrot.slane %v4708_v17, 1  ;;  %v544_v55 = vrot.slane %v4708_v17, 7 }
  0x18   : > { %3984 = vmatprep.subr.bf16.mxu1 %v3983_v47  ;;  %v983_v26 = vld [vmem:[%s6114_s3 + $0x110] sm:$0xff]  ;;  %v984_v27 = vld [vmem:[%s6114_s3 + $0x118] sm:$0xff]  ;;  %v566_v28 = vrot.slane %v4713_v21, 1  ;;  %v4731_v29 = vld [vmem:[%s4618_s29 + $0x20] sm:$0xff]  ;;  %v3999_v30 = vpack.c.bf16 %v966_v23, %v965_v22  ;;  %v562_v33 = vsel %vm552_vm1, %v551_v20, %v542_v19  ;;  %v545_v5 = vrot.slane %v4713_v21, 7 }
  0x19   : > { %3954 = vmatpush3.bf16.msra.mxu0 %v3953_v49  ;;  %v949_v31 = vld [vmem:[%s6114_s3] sm:$0xff]  ;;  %v950_v32 = vld [vmem:[%s6114_s3 + $0x8] sm:$0xff]  ;;  %v967_v36 = vld [vmem:[%s6114_s3 + $0x90] sm:$0xff]  ;;  %v4035_v38 = vpack.c.bf16 %v984_v27, %v983_v26  ;;  %v581_v39 = vsel %vm573_vm0, %v564_v57, %v565_v25  ;;  %v567_v40 = vrot.slane %v4731_v29, 1  ;;  %v560_v4 = vsel %vm552_vm1, %v543_v34, %v544_v55 }
  0x1a   : > { %3956 = vmatprep.subr.bf16.mxu0 %v3955_v54  ;;  %v4745_v35 = vld [vmem:[%s4618_s29 + $0x28] sm:$0xff]  ;;  %v968_v37 = vld [vmem:[%s6114_s3 + $0x98] sm:$0xff]  ;;  %v4001_v41 = vpack.c.bf16 %v950_v32, %v949_v31  ;;  %v985_v42 = vld [vmem:[%s6114_s3 + $0x120] sm:$0xff]  ;;  %v580_v44 = vsel %vm573_vm0, %v565_v25, %v566_v28  ;;  %v561_v54 = vsel %vm552_vm1, %v542_v19, %v543_v34  ;;  %v583_v31 = vsel %vm573_vm0, %v572_v12, %v563_v52 }
  0x1b   : > { %3986 = vmatpush3.bf16.msra.mxu1 %v3983_v47  ;;  %v986_v43 = vld [vmem:[%s6114_s3 + $0x128] sm:$0xff]  ;;  %v568_v45 = vrot.slane %v4745_v35, 1  ;;  %v4768_v47 = vld [vmem:[%s4618_s29 + $0x30] sm:$0xff]  ;;  %v4003_v49 = vpack.c.bf16 %v968_v37, %v967_v36  ;;  %v952_v51 = vld [vmem:[%s6114_s3 + $0x18] sm:$0xff]  ;;  %v579_v59 = vsel %vm573_vm0, %v566_v28, %v567_v40 }
  0x1c   : > { %3988 = vmatprep.subr.bf16.mxu1 %v3987_v60  ;;  %v951_v50 = vld [vmem:[%s6114_s3 + $0x10] sm:$0xff]  ;;  %v4781_v56 = vld [vmem:[%s4618_s29 + $0x38] sm:$0xff]  ;;  %v969_v57 = vld [vmem:[%s6114_s3 + $0xa0] sm:$0xff] }
  0x1d   : > { %3958 = vmatpush3.bf16.msra.mxu0 %v3957_v62  ;;  %v970_v58 = vld [vmem:[%s6114_s3 + $0xa8] sm:$0xff]  ;;  %v4005_v61 = vpack.c.bf16 %v952_v51, %v951_v50  ;;  %v578_v62 = vsel %vm573_vm0, %v567_v40, %v568_v45  ;;  %v570_v63 = vrot.slane %v4781_v56, 1  ;;  %v4796_v0 = vld [vmem:[%s4618_s29 + $0x40] sm:$0xff]  ;;  %v955_v15 = vld [vmem:[%s6114_s3 + $0x30] sm:$0xff]  ;;  %v549_v52 = vrot.slane %v4781_v56, 7 }
  0x1e   : > { %3960 = vmatprep.subr.bf16.mxu0 %v3959_v1  ;;  %v4007_v1 = vpack.c.bf16 %v970_v58, %v969_v57  ;;  %v953_v2 = vld [vmem:[%s6114_s3 + $0x20] sm:$0xff]  ;;  %v954_v3 = vld [vmem:[%s6114_s3 + $0x28] sm:$0xff]  ;;  %v571_v9 = vrot.slane %v4796_v0, 1  ;;  %v987_v37 = vld [vmem:[%s6114_s3 + $0x130] sm:$0xff] }
  0x1f   : > { %3990 = vmatpush3.bf16.msra.mxu1 %v3987_v60  ;;  %v569_v60 = vrot.slane %v4768_v47, 1  ;;  %v973_v19 = vld [vmem:[%s6114_s3 + $0xc0] sm:$0xff]  ;;  %v974_v22 = vld [vmem:[%s6114_s3 + $0xc8] sm:$0xff] }
  0x20   : > { %3992 = vmatprep.subr.bf16.mxu1 %v3991_v6  ;;  %v575_v23 = vsel %vm573_vm0, %v570_v63, %v571_v9  ;;  %v4015_v25 = vpack.c.bf16 %v974_v22, %v973_v19  ;;  %v957_v26 = vld [vmem:[%s6114_s3 + $0x40] sm:$0xff]  ;;  %v958_v27 = vld [vmem:[%s6114_s3 + $0x48] sm:$0xff] }
  0x21   : > { %3962 = vmatpush3.bf16.msra.mxu0 %v3961_v7  ;;  %v972_v7 = vld [vmem:[%s6114_s3 + $0xb8] sm:$0xff]  ;;  %v577_v8 = vsel %vm573_vm0, %v568_v45, %v569_v60  ;;  %v576_v11 = vsel %vm573_vm0, %v569_v60, %v570_v63  ;;  %v4017_v32 = vpack.c.bf16 %v958_v27, %v957_v26  ;;  %v989_v50 = vld [vmem:[%s6114_s3 + $0x140] sm:$0xff]  ;;  %v962_v57 = vld [vmem:[%s6114_s3 + $0x68] sm:$0xff] }
  0x22   : > { %3964 = vmatprep.subr.bf16.mxu0 %v3963_v10  ;;  %v4009_v10 = vpack.c.bf16 %v954_v3, %v953_v2  ;;  %v991_v60 = vld [vmem:[%s6114_s3 + $0x150] sm:$0xff]  ;;  %v993_v3 = vld [vmem:[%s6114_s3 + $0x160] sm:$0xff] }
  0x23   : > { %3994 = vmatpush3.bf16.msra.mxu1 %v3991_v6  ;;  %v971_v6 = vld [vmem:[%s6114_s3 + $0xb0] sm:$0xff] }
  0x24   : > { %3996 = vmatprep.subr.bf16.mxu1 %v3995_v16  ;;  %v4011_v14 = vpack.c.bf16 %v972_v7, %v971_v6  ;;  %v963_v63 = vld [vmem:[%s6114_s3 + $0x70] sm:$0xff] }
  0x25   : > { %3966 = vmatpush3.bf16.msra.mxu0 %v3965_v18  ;;  %v546_v18 = vrot.slane %v4731_v29, 7  ;;  %v995_v7 = vld [vmem:[%s6114_s3 + $0x170] sm:$0xff] }
  0x26   : > { %4032 = vmatprep.subr.bf16.mxu0 %v4031_v24 }
  0x27   : > { %3998 = vmatpush3.bf16.msra.mxu1 %v3995_v16  ;;  %v956_v16 = vld [vmem:[%s6114_s3 + $0x38] sm:$0xff]  ;;  %v558_v28 = vsel %vm552_vm1, %v545_v5, %v546_v18 }
  0x28   : > { %704 = vmatmul.mubr.f32.vlgmr.msra.gmra.mrb[0].mxu0 %v562_v33  ;;  %4000 = vmatprep.subr.bf16.mxu1 %v3999_v30  ;;  %v547_v30 = vrot.slane %v4745_v35, 7  ;;  %v548_v33 = vrot.slane %v4768_v47, 7 }
  0x29   : > { %708 = vmatprep.mubr.f32.mxu0 %v4646_v53  ;;  %4034 = vmatpush3.bf16.msra.mxu0 %v4031_v24  ;;  %v4039_v53 = vpack.c.bf16 %v986_v43, %v985_v42  ;;  %v574_v24 = vsel %vm573_vm0, %v571_v9, %v572_v12  ;;  %v959_v42 = vld [vmem:[%s6114_s3 + $0x50] sm:$0xff]  ;;  %v960_v43 = vld [vmem:[%s6114_s3 + $0x58] sm:$0xff]  ;;  %v1319_v12 = vld [vmem:[%s6116_s5 + $0x108] sm:$0xff] }
  0x2a   : > { %3639 = vmatmul.mubr.f32.vlgmr.msra.gmra.mrb[0].mxu1 %v581_v39  ;;  %4036 = vmatprep.subr.bf16.mxu0 %v4035_v38  ;;  %v556_v48 = vsel %vm552_vm1, %v547_v30, %v548_v33  ;;  %v555_v34 = vsel %vm552_vm1, %v548_v33, %v549_v52  ;;  %v975_v39 = vld [vmem:[%s6114_s3 + $0xd0] sm:$0xff]  ;;  %v4021_v45 = vpack.c.bf16 %v960_v43, %v959_v42 }
  0x2b   : > { %3641 = vmatprep.mubr.f32.mxu1 %v580_v44  ;;  %4002 = vmatpush3.bf16.msra.mxu1 %v4001_v41  ;;  %v976_v41 = vld [vmem:[%s6114_s3 + $0xd8] sm:$0xff]  ;;  %v1320_v33 = vld [vmem:[%s6116_s5 + $0x110] sm:$0xff] }
  0x2c   : > { %709 = vmatmul.mubr.f32.gmra.mrb[2].mxu0 %v561_v54  ;;  %4004 = vmatprep.subr.bf16.mxu1 %v4003_v49  ;;  %v4019_v44 = vpack.c.bf16 %v976_v41, %v975_v39  ;;  %v978_v49 = vld [vmem:[%s6114_s3 + $0xe8] sm:$0xff] }
  0x2d   : > { %713 = vmatprep.mubr.f32.mxu0 %v4708_v17  ;;  %4038 = vmatpush3.bf16.msra.mxu0 %v4035_v38  ;;  %v559_v17 = vsel %vm552_vm1, %v544_v55, %v545_v5  ;;  %v988_v38 = vld [vmem:[%s6114_s3 + $0x138] sm:$0xff]  ;;  %v990_v54 = vld [vmem:[%s6114_s3 + $0x148] sm:$0xff]  ;;  %v961_v55 = vld [vmem:[%s6114_s3 + $0x60] sm:$0xff] }
  0x2e   : > { %3642 = vmatmul.mubr.f32.gmra.mrb[2].mxu1 %v579_v59  ;;  %4040 = vmatprep.subr.bf16.mxu0 %v4039_v53  ;;  %v4043_v40 = vpack.c.bf16 %v988_v38, %v987_v37  ;;  %v4025_v58 = vpack.c.bf16 %v962_v57, %v961_v55  ;;  %v980_v59 = vld [vmem:[%s6114_s3 + $0xf8] sm:$0xff] }
  0x2f   : > { %3644 = vmatprep.mubr.f32.mxu1 %v578_v62  ;;  %4006 = vmatpush3.bf16.msra.mxu1 %v4005_v61  ;;  %v992_v62 = vld [vmem:[%s6114_s3 + $0x158] sm:$0xff] }
  0x30   : > { %714 = vmatmul.mubr.f32.gmra.mrb[4].mxu0 %v560_v4  ;;  %4008 = vmatprep.subr.bf16.mxu1 %v4007_v1  ;;  %v4051_v1 = vpack.c.bf16 %v992_v62, %v991_v60  ;;  %v994_v4 = vld [vmem:[%s6114_s3 + $0x168] sm:$0xff]  ;;  %v1305_v60 = vld [vmem:[%s6116_s5 + $0x98] sm:$0xff] }
  0x31   : > { %718 = vmatprep.mubr.f32.mxu0 %v4713_v21  ;;  %4042 = vmatpush3.bf16.msra.mxu0 %v4039_v53  ;;  %v4013_v21 = vpack.c.bf16 %v956_v16, %v955_v15  ;;  %v979_v53 = vld [vmem:[%s6114_s3 + $0xf0] sm:$0xff]  ;;  %v4055_v6 = vpack.c.bf16 %v994_v4, %v993_v3 }
  0x32   : > { %3645 = vmatmul.mubr.f32.gmra.mrb[4].mxu1 %v577_v8  ;;  %4044 = vmatprep.subr.bf16.mxu0 %v4043_v40  ;;  %v4027_v61 = vpack.c.bf16 %v980_v59, %v979_v53  ;;  %v996_v8 = vld [vmem:[%s6114_s3 + $0x178] sm:$0xff]  ;;  %v1287_v53 = vld [vmem:[%s6116_s5 + $0x8] sm:$0xff]  ;;  %v1304_v59 = vld [vmem:[%s6116_s5 + $0x90] sm:$0xff] }
  0x33   : > { %3647 = vmatprep.mubr.f32.mxu1 %v576_v11  ;;  %4010 = vmatpush3.bf16.msra.mxu1 %v4009_v10  ;;  %v4059_v9 = vpack.c.bf16 %v996_v8, %v995_v7  ;;  %v1318_v11 = vld [vmem:[%s6116_s5 + $0x100] sm:$0xff]  ;;  %v4067_v4 = vpack.c.bf16 %v1305_v60, %v1304_v59 }
  0x34   : > { %719 = vmatmul.mubr.f32.gmra.mrb[6].mxu0 %v559_v17  ;;  %4012 = vmatprep.subr.bf16.mxu1 %v4011_v14  ;;  %v4095_v14 = vpack.c.bf16 %v1319_v12, %v1318_v11  ;;  %v4955_v17 = vld [vmem:[%s6113_s2] ss:$0 sm:$0xff]  ;;  %v1307_v12 = vld [vmem:[%s6116_s5 + $0xa8] sm:$0xff] }
  0x35   : > { %723 = vmatprep.mubr.f32.mxu0 %v4731_v29  ;;  %v557_v29 = vsel %vm552_vm1, %v546_v18, %v547_v30  ;;  %4046 = vmatpush3.bf16.msra.mxu0 %v4043_v40  ;;  %v1306_v11 = vld [vmem:[%s6116_s5 + $0xa0] sm:$0xff] }
  0x36   : > { %3648 = vmatmul.mubr.f32.gmra.mrb[6].mxu1 %v575_v23 }
  0x37   : > { %3650 = vmatprep.mubr.f32.mxu1 %v574_v24  ;;  %4014 = vmatpush3.bf16.msra.mxu1 %v4013_v21 }
  0x38   : > { %724 = vmatmul.mubr.f32.gmra.mrb[8].mxu0 %v558_v28  ;;  %4016 = vmatprep.subr.bf16.mxu1 %v4015_v25 }
  0x39   : > { %728 = vmatprep.mubr.f32.mxu0 %v4745_v35  ;;  %v550_v35 = vrot.slane %v4796_v0, 7 }
  0x3a   : > { %3651 = vmatmul.mubr.f32.gmra.mrb[8].mxu1 %v583_v31  ;;  %v4451_v31 = vmov 0.0  }
  0x3b   : > { %4018 = vmatpush3.bf16.msra.mxu1 %v4017_v32  ;;  %v554_v36 = vsel %vm552_vm1, %v549_v52, %v550_v35  ;;  %v553_v5 = vsel %vm552_vm1, %v550_v35, %v551_v20  ;;  %v1303_v20 = vld [vmem:[%s6116_s5 + $0x88] sm:$0xff]  ;;  %v4961_v32 = vrot.slane %v4451_v31, 7 }
  0x3c   : > { %729 = vmatmul.mubr.f32.gmra.mrb[10].mxu0 %v557_v29  ;;  %4020 = vmatprep.subr.bf16.mxu1 %v4019_v44  ;;  %v4964_v29 = vrot.slane %v4451_v31, 1  ;;  %v1322_v44 = vld [vmem:[%s6116_s5 + $0x120] sm:$0xff] }
  0x3d   : > { %733 = vmatprep.mubr.f32.mxu0 %v4768_v47  ;;  %v977_v47 = vld [vmem:[%s6114_s3 + $0xe0] sm:$0xff] }
  0x3e   : > { %v4023_v51 = vpack.c.bf16 %v978_v49, %v977_v47 }
  0x3f   : > { %4022 = vmatpush3.bf16.msra.mxu1 %v4021_v45  ;;  %v1323_v45 = vld [vmem:[%s6116_s5 + $0x128] sm:$0xff] }
  0x40   : > { %734 = vmatmul.mubr.f32.gmra.mrb[12].mxu0 %v556_v48  ;;  %4024 = vmatprep.subr.bf16.mxu1 %v4023_v51  ;;  %v1321_v48 = vld [vmem:[%s6116_s5 + $0x118] sm:$0xff]  ;;  %v4103_v55 = vpack.c.bf16 %v1323_v45, %v1322_v44  ;;  %v1311_v44 = vld [vmem:[%s6116_s5 + $0xc8] sm:$0xff] }
  0x41   : > { %738 = vmatprep.mubr.f32.mxu0 %v4781_v56  ;;  %v4047_v56 = vpack.c.bf16 %v990_v54, %v989_v50  ;;  %v4099_v39 = vpack.c.bf16 %v1321_v48, %v1320_v33  ;;  %v1286_v54 = vld [vmem:[%s6116_s5] sm:$0xff] }
  0x42   : > { %v4065_v3 = vpack.c.bf16 %v1287_v53, %v1286_v54 }
  0x43   : > { %4048 = vmatprep.subr.bf16.mxu0 %v4047_v56  ;;  %4026 = vmatpush3.bf16.msra.mxu1 %v4025_v58 }
  0x44   : > { %739 = vmatmul.mubr.f32.gmra.mrb[14].mxu0 %v555_v34  ;;  %4028 = vmatprep.subr.bf16.mxu1 %v4027_v61 }
  0x45   : > { %743 = vmatprep.mubr.f32.mxu0 %v4796_v0  ;;  %4050 = vmatpush3.bf16.msra.mxu0 %v4047_v56  ;;  %v964_v0 = vld [vmem:[%s6114_s3 + $0x78] sm:$0xff] }
  0x46   : > { %v4029_v2 = vpack.c.bf16 %v964_v0, %v963_v63  ;;  %4052 = vmatprep.subr.bf16.mxu0 %v4051_v1 }
  0x48   : > { %744 = vmatmul.mubr.f32.gmra.mrb[16].mxu0 %v554_v36  ;;  %4030 = vmatpush3.bf16.msra.mxu1 %v4029_v2 }
  0x49   : > { %748 = vmatprep.mubr.f32.mxu0 %v4699_v13  ;;  %4054 = vmatpush3.bf16.msra.mxu0 %v4051_v1  ;;  %v1302_v13 = vld [vmem:[%s6116_s5 + $0x80] sm:$0xff] }
  0x4a   : > { %4056 = vmatprep.subr.bf16.mxu0 %v4055_v6  ;;  %v4063_v10 = vpack.c.bf16 %v1303_v20, %v1302_v13  ;;  %4096 = vmatprep.subr.bf16.mxu1 %v4095_v14  ;;  %v1288_v13 = vld [vmem:[%s6116_s5 + $0x10] sm:$0xff]  ;;  %v1289_v20 = vld [vmem:[%s6116_s5 + $0x18] sm:$0xff] }
  0x4c   : > { %749 = vmatmul.mubr.f32.gmra.mrb[18].mxu0 %v553_v5 }
  0x4d   : > { %4058 = vmatpush3.bf16.msra.mxu0 %v4055_v6 }
  0x4e   : > { %4060 = vmatprep.subr.bf16.mxu0 %v4059_v9 }
  0x51   : > { %4062 = vmatpush3.bf16.msra.mxu0 %v4059_v9 }
  0x52   : > { %4064 = vmatprep.subr.bf16.mxu0 %v4063_v10 }
  0xfb   : > { %v3022_v15 = vpop.f32.mrb[0].mxu0 }
  0xfc   : > { %v3023_v16 = vpop.f32.mrb[1].mxu0 }
  0xfd   : > { %v3024_v18 = vadd.f32 %v3023_v16, %v3022_v15  ;;  %v3640_v19 = vpop.f32.mrb[0].mxu1  ;;  %v4069_v15 = vpack.c.bf16 %v1289_v20, %v1288_v13  ;;  %v1290_v16 = vld [vmem:[%s6116_s5 + $0x20] sm:$0xff] }
  0xfe   : > { %v820_v22 = vpop.f32.mrb[1].mxu1 }
  0xff   : > { %v3025_v23 = vpop.f32.mrb[2].mxu0  ;;  %v706_v21 = vadd.f32 %v3024_v18, %v4955_v17 }
 0x100   : > { %v3026_v24 = vpop.f32.mrb[3].mxu0  ;;  %v4071_v23 = vpack.c.bf16 %v1307_v12, %v1306_v11  ;;  %v1313_v12 = vld [vmem:[%s6116_s5 + $0xd8] sm:$0xff] }
 0x101   : > { %v821_v25 = vadd.f32 %v820_v22, %v706_v21  ;;  %v3643_v26 = vpop.f32.mrb[2].mxu1  ;;  %v1291_v21 = vld [vmem:[%s6116_s5 + $0x28] sm:$0xff]  ;;  %v1308_v24 = vld [vmem:[%s6116_s5 + $0xb0] sm:$0xff] }
 0x102   : > { %v830_v27 = vpop.f32.mrb[3].mxu1  ;;  %v4073_v48 = vpack.c.bf16 %v1291_v21, %v1290_v16 }
 0x103   : > { %v4958_v28 = vmax.f32 %v821_v25, 0.0  ;;  %v3028_v30 = vpop.f32.mrb[4].mxu0  ;;  %v1309_v25 = vld [vmem:[%s6116_s5 + $0xb8] sm:$0xff] }
 0x104   : > { %v3029_v52 = vpop.f32.mrb[5].mxu0 }
 0x105   : > { %v909_v34 = vrot.slane %v4958_v28, 7  ;;  %v929_v35 = vrot.slane %v4958_v28, 1  ;;  %v3030_v36 = vadd.f32 %v3029_v52, %v3028_v30  ;;  %1068 = vmatprep.mubr.f32.mxu1 %v4958_v28  ;;  %v3646_v37 = vpop.f32.mrb[4].mxu1  ;;  %v4075_v52 = vpack.c.bf16 %v1309_v25, %v1308_v24  ;;  %v1324_v28 = vld [vmem:[%s6116_s5 + $0x130] sm:$0xff]  ;;  %v1315_v24 = vld [vmem:[%s6116_s5 + $0xe8] sm:$0xff]  ;;  %v1298_v25 = vld [vmem:[%s6116_s5 + $0x60] sm:$0xff] }
 0x106   : > { %v840_v38 = vpop.f32.mrb[5].mxu1 }
 0x107   : > { %v3031_v40 = vpop.f32.mrb[6].mxu0  ;;  %v716_v41 = vadd.f32 %v3030_v36, %v4955_v17  ;;  %v928_v42 = vsel %vm552_vm1, %v4961_v32, %v909_v34  ;;  %v947_v43 = vsel %vm573_vm0, %v929_v35, %v4964_v29  ;;  %v927_v58 = vsel %vm552_vm1, %v909_v34, %v4961_v32 }
 0x108   : > { %v3032_v47 = vpop.f32.mrb[7].mxu0  ;;  %1069 = vmatmul.mubr.f32.vlgmr.msra.gmra.mrb[10].mxu1 %v928_v42  ;;  %3685 = vmatprep.mubr.f32.mxu0 %v947_v43  ;;  %v1292_v40 = vld [vmem:[%s6116_s5 + $0x30] sm:$0xff]  ;;  %v1310_v43 = vld [vmem:[%s6116_s5 + $0xc0] sm:$0xff] }
 0x109   : > { %v831_v49 = vadd.f32 %v830_v27, %v716_v41  ;;  %1073 = vmatprep.mubr.f32.mxu1 %v4451_v31  ;;  %v3649_v50 = vpop.f32.mrb[6].mxu1  ;;  %4098 = vmatpush3.bf16.msra.mxu1 %v4095_v14  ;;  %v1293_v41 = vld [vmem:[%s6116_s5 + $0x38] sm:$0xff] }
 0x10a   : > { %v4991_v51 = vpop.f32.mrb[7].mxu1  ;;  %4100 = vmatprep.subr.bf16.mxu1 %v4099_v39  ;;  %v4077_v47 = vpack.c.bf16 %v1293_v41, %v1292_v40  ;;  %v1330_v41 = vld [vmem:[%s6116_s5 + $0x160] sm:$0xff] }
 0x10b   : > { %v871_v56 = vmax.f32 %v831_v49, 0.0  ;;  %v3034_v57 = vpop.f32.mrb[8].mxu0 }
 0x10c   : > { %v3035_v61 = vpop.f32.mrb[9].mxu0  ;;  %1074 = vmatmul.mubr.f32.gmra.mrb[12].mxu1 %v927_v58 }
 0x10d   : > { %v911_v62 = vrot.slane %v871_v56, 7  ;;  %v931_v63 = vrot.slane %v871_v56, 1  ;;  %v3036_v0 = vadd.f32 %v3035_v61, %v3034_v57  ;;  %1078 = vmatprep.mubr.f32.mxu1 %v871_v56  ;;  %v3652_v1 = vpop.f32.mrb[8].mxu1  ;;  %4102 = vmatpush3.bf16.msra.mxu1 %v4099_v39 }
 0x10e   : > { %v5008_v2 = vpop.f32.mrb[9].mxu1  ;;  %4104 = vmatprep.subr.bf16.mxu1 %v4103_v55 }
 0x10f   : > { %v3037_v5 = vpop.f32.mrb[10].mxu0  ;;  %v726_v6 = vadd.f32 %v3036_v0, %v4955_v17  ;;  %v926_v7 = vsel %vm552_vm1, %v4961_v32, %v911_v62  ;;  %v946_v8 = vsel %vm573_vm0, %v4964_v29, %v931_v63  ;;  %v945_v9 = vsel %vm573_vm0, %v931_v63, %v4964_v29 }
 0x110   : > { %v3038_v10 = vpop.f32.mrb[11].mxu0  ;;  %1079 = vmatmul.mubr.f32.gmra.mrb[14].mxu1 %v926_v7  ;;  %3686 = vmatmul.mubr.f32.vlgmr.msra.gmra.mrb[20].mxu0 %v946_v8  ;;  %v925_v22 = vsel %vm552_vm1, %v911_v62, %v4961_v32  ;;  %v1294_v7 = vld [vmem:[%s6116_s5 + $0x40] sm:$0xff]  ;;  %v1295_v8 = vld [vmem:[%s6116_s5 + $0x48] sm:$0xff] }
 0x111   : > { %v841_v14 = vadd.f32 %v840_v38, %v726_v6  ;;  %3688 = vmatprep.mubr.f32.mxu0 %v945_v9  ;;  %1083 = vmatprep.mubr.f32.mxu1 %v4451_v31  ;;  %v948_v6 = vsel %vm573_vm0, %v4964_v29, %v929_v35  ;;  %v4081_v9 = vpack.c.bf16 %v1295_v8, %v1294_v7  ;;  %v1325_v35 = vld [vmem:[%s6116_s5 + $0x138] sm:$0xff]  ;;  %v1312_v10 = vld [vmem:[%s6116_s5 + $0xd0] sm:$0xff] }
 0x112   : > { %4066 = vmatpush3.bf16.msra.mxu0 %v4065_v3  ;;  %4106 = vmatpush3.bf16.msra.mxu1 %v4103_v55  ;;  %v4079_v55 = vpack.c.bf16 %v1311_v44, %v1310_v43  ;;  %v4107_v11 = vpack.c.bf16 %v1325_v35, %v1324_v28  ;;  %v4083_v16 = vpack.c.bf16 %v1313_v12, %v1312_v10  ;;  %v1332_v44 = vld [vmem:[%s6116_s5 + $0x170] sm:$0xff] }
 0x113   : > { %v873_v18 = vmax.f32 %v841_v14, 0.0  ;;  %v3040_v19 = vpop.f32.mrb[12].mxu0  ;;  %4068 = vmatprep.subr.bf16.mxu0 %v4067_v4  ;;  %v1296_v14 = vld [vmem:[%s6116_s5 + $0x50] sm:$0xff] }
 0x114   : > { %v3041_v26 = vpop.f32.mrb[13].mxu0  ;;  %1084 = vmatmul.mubr.f32.gmra.mrb[16].mxu1 %v925_v22  ;;  %4108 = vmatprep.subr.bf16.mxu1 %v4107_v11  ;;  %v1327_v22 = vld [vmem:[%s6116_s5 + $0x148] sm:$0xff] }
 0x115   : > { %v913_v27 = vrot.slane %v873_v18, 7  ;;  %v933_v30 = vrot.slane %v873_v18, 1  ;;  %v3042_v33 = vadd.f32 %v3041_v26, %v3040_v19  ;;  %1088 = vmatprep.mubr.f32.mxu1 %v873_v18  ;;  %v1326_v19 = vld [vmem:[%s6116_s5 + $0x140] sm:$0xff]  ;;  %v1299_v26 = vld [vmem:[%s6116_s5 + $0x68] sm:$0xff] }
 0x116   : > { %4070 = vmatpush3.bf16.msra.mxu0 %v4069_v15  ;;  %v1297_v15 = vld [vmem:[%s6116_s5 + $0x58] sm:$0xff]  ;;  %4110 = vmatpush3.bf16.msra.mxu1 %v4107_v11  ;;  %v4111_v21 = vpack.c.bf16 %v1327_v22, %v1326_v19  ;;  %v1641_v22 = vld [vmem:[%s6118_s7 + $0x90] sm:$0xff] }
 0x117   : > { %v3043_v34 = vpop.f32.mrb[14].mxu0  ;;  %v736_v36 = vadd.f32 %v3042_v33, %v4955_v17  ;;  %v924_v37 = vsel %vm552_vm1, %v4961_v32, %v913_v27  ;;  %v944_v38 = vsel %vm573_vm0, %v4964_v29, %v933_v30  ;;  %v943_v39 = vsel %vm573_vm0, %v933_v30, %v4964_v29  ;;  %4072 = vmatprep.subr.bf16.mxu0 %v4071_v23  ;;  %v1314_v23 = vld [vmem:[%s6116_s5 + $0xe0] sm:$0xff]  ;;  %v1316_v33 = vld [vmem:[%s6116_s5 + $0xf0] sm:$0xff] }
 0x118   : > { %v3044_v42 = vpop.f32.mrb[15].mxu0  ;;  %1089 = vmatmul.mubr.f32.gmra.mrb[18].mxu1 %v924_v37  ;;  %3689 = vmatmul.mubr.f32.gmra.mrb[22].mxu0 %v944_v38  ;;  %v923_v54 = vsel %vm552_vm1, %v913_v27, %v4961_v32  ;;  %v4085_v18 = vpack.c.bf16 %v1297_v15, %v1296_v14  ;;  %v4087_v27 = vpack.c.bf16 %v1315_v24, %v1314_v23  ;;  %v1300_v37 = vld [vmem:[%s6116_s5 + $0x70] sm:$0xff]  ;;  %v1301_v38 = vld [vmem:[%s6116_s5 + $0x78] sm:$0xff]  ;;  %v1623_v14 = vld [vmem:[%s6118_s7] sm:$0xff] }
 0x119   : > { %v851_v45 = vadd.f32 %v4991_v51, %v736_v36  ;;  %3691 = vmatprep.mubr.f32.mxu0 %v943_v39  ;;  %1093 = vmatprep.mubr.f32.mxu1 %v4451_v31  ;;  %v4089_v30 = vpack.c.bf16 %v1299_v26, %v1298_v25  ;;  %v1329_v36 = vld [vmem:[%s6116_s5 + $0x158] sm:$0xff]  ;;  %v4093_v40 = vpack.c.bf16 %v1301_v38, %v1300_v37  ;;  %v1331_v42 = vld [vmem:[%s6116_s5 + $0x168] sm:$0xff] }
 0x11a   : > { %4074 = vmatpush3.bf16.msra.mxu0 %v4073_v48  ;;  %4112 = vmatprep.subr.bf16.mxu1 %v4111_v21  ;;  %v1317_v48 = vld [vmem:[%s6116_s5 + $0xf8] sm:$0xff]  ;;  %v4119_v43 = vpack.c.bf16 %v1331_v42, %v1330_v41  ;;  %v1624_v15 = vld [vmem:[%s6118_s7 + $0x8] sm:$0xff] }
 0x11b   : > { %v875_v49 = vmax.f32 %v851_v45, 0.0  ;;  %v3046_v50 = vpop.f32.mrb[16].mxu0  ;;  %4076 = vmatprep.subr.bf16.mxu0 %v4075_v52  ;;  %4114 = vmatpush3.bf16.msra.mxu1 %v4111_v21  ;;  %v1328_v52 = vld [vmem:[%s6116_s5 + $0x150] sm:$0xff]  ;;  %v4091_v34 = vpack.c.bf16 %v1317_v48, %v1316_v33  ;;  %v1333_v45 = vld [vmem:[%s6116_s5 + $0x178] sm:$0xff] }
 0x11c   : > { %v3047_v56 = vpop.f32.mrb[17].mxu0  ;;  %1094 = vmatmul.mubr.f32.gmra.mrb[20].mxu1 %v923_v54  ;;  %v4115_v39 = vpack.c.bf16 %v1329_v36, %v1328_v52  ;;  %v1642_v23 = vld [vmem:[%s6118_s7 + $0x98] sm:$0xff]  ;;  %v1661_v21 = vld [vmem:[%s6118_s7 + $0x130] sm:$0xff]  ;;  %v1644_v36 = vld [vmem:[%s6118_s7 + $0xa8] sm:$0xff] }
 0x11d   : > { %v915_v57 = vrot.slane %v875_v49, 7  ;;  %v935_v58 = vrot.slane %v875_v49, 1  ;;  %v3048_v53 = vadd.f32 %v3047_v56, %v3046_v50  ;;  %1098 = vmatprep.mubr.f32.mxu1 %v875_v49  ;;  %v1639_v49 = vld [vmem:[%s6118_s7 + $0x80] sm:$0xff]  ;;  %v1640_v50 = vld [vmem:[%s6118_s7 + $0x88] sm:$0xff]  ;;  %v1662_v24 = vld [vmem:[%s6118_s7 + $0x138] sm:$0xff]  ;;  %v4131_v33 = vpack.c.bf16 %v1642_v23, %v1641_v22 }
 0x11e   : > { %4078 = vmatpush3.bf16.msra.mxu0 %v4077_v47  ;;  %4116 = vmatprep.subr.bf16.mxu1 %v4115_v39  ;;  %v4123_v47 = vpack.c.bf16 %v1333_v45, %v1332_v44  ;;  %v4127_v54 = vpack.c.bf16 %v1640_v50, %v1639_v49  ;;  %v1656_v56 = vld [vmem:[%s6118_s7 + $0x108] sm:$0xff]  ;;  %v1625_v48 = vld [vmem:[%s6118_s7 + $0x10] sm:$0xff]  ;;  %v1626_v52 = vld [vmem:[%s6118_s7 + $0x18] sm:$0xff]  ;;  %v4171_v37 = vpack.c.bf16 %v1662_v24, %v1661_v21 }
 0x11f   : > { %v746_v51 = vadd.f32 %v3048_v53, %v4955_v17  ;;  %v922_v59 = vsel %vm552_vm1, %v4961_v32, %v915_v57  ;;  %v942_v60 = vsel %vm573_vm0, %v4964_v29, %v935_v58  ;;  %v941_v61 = vsel %vm573_vm0, %v935_v58, %v4964_v29  ;;  %4080 = vmatprep.subr.bf16.mxu0 %v4079_v55  ;;  %v3049_v13 = vpop.f32.mrb[18].mxu0  ;;  %v1655_v55 = vld [vmem:[%s6118_s7 + $0x100] sm:$0xff]  ;;  %v1634_v22 = vld [vmem:[%s6118_s7 + $0x58] sm:$0xff]  ;;  %v1664_v24 = vld [vmem:[%s6118_s7 + $0x148] sm:$0xff] }
 0x120   : > { %1099 = vmatmul.mubr.f32.gmra.mrb[22].mxu1 %v922_v59  ;;  %3692 = vmatmul.mubr.f32.gmra.mrb[24].mxu0 %v942_v60  ;;  %v921_v63 = vsel %vm552_vm1, %v915_v57, %v4961_v32  ;;  %v3050_v20 = vpop.f32.mrb[19].mxu0  ;;  %v4159_v57 = vpack.c.bf16 %v1656_v56, %v1655_v55  ;;  %v1659_v13 = vld [vmem:[%s6118_s7 + $0x120] sm:$0xff]  ;;  %v4133_v41 = vpack.c.bf16 %v1626_v52, %v1625_v48  ;;  %v1646_v55 = vld [vmem:[%s6118_s7 + $0xb8] sm:$0xff]  ;;  %v1636_v48 = vld [vmem:[%s6118_s7 + $0x68] sm:$0xff] }
 0x121   : > { %v861_v62 = vadd.f32 %v5008_v2, %v746_v51  ;;  %3694 = vmatprep.mubr.f32.mxu0 %v941_v61  ;;  %1103 = vmatprep.mubr.f32.mxu1 %v4451_v31  ;;  %v5195_v61 = vld [vmem:[%s6115_s4] ss:$0 sm:$0xff]  ;;  %v1660_v20 = vld [vmem:[%s6118_s7 + $0x128] sm:$0xff] }
 0x122   : > { %4082 = vmatpush3.bf16.msra.mxu0 %v4081_v9  ;;  %4118 = vmatpush3.bf16.msra.mxu1 %v4115_v39  ;;  %v1627_v45 = vld [vmem:[%s6118_s7 + $0x20] sm:$0xff] }
 0x123   : > { %v877_v17 = vmax.f32 %v861_v62, 0.0  ;;  %4084 = vmatprep.subr.bf16.mxu0 %v4083_v16  ;;  %4120 = vmatprep.subr.bf16.mxu1 %v4119_v43  ;;  %v4167_v16 = vpack.c.bf16 %v1660_v20, %v1659_v13  ;;  %v1663_v21 = vld [vmem:[%s6118_s7 + $0x140] sm:$0xff] }
 0x124   : > { %1104 = vmatmul.mubr.f32.gmra.mrb[24].mxu1 %v921_v63 }
 0x125   : > { %v917_v0 = vrot.slane %v877_v17, 7  ;;  %v937_v1 = vrot.slane %v877_v17, 1  ;;  %1108 = vmatprep.mubr.f32.mxu1 %v877_v17 }
 0x126   : > { %4086 = vmatpush3.bf16.msra.mxu0 %v4085_v18  ;;  %4122 = vmatpush3.bf16.msra.mxu1 %v4119_v43 }
 0x127   : > { %v920_v3 = vsel %vm552_vm1, %v4961_v32, %v917_v0  ;;  %v940_v2 = vsel %vm573_vm0, %v4964_v29, %v937_v1  ;;  %v939_v4 = vsel %vm573_vm0, %v937_v1, %v4964_v29  ;;  %v919_v5 = vsel %vm552_vm1, %v917_v0, %v4961_v32  ;;  %4088 = vmatprep.subr.bf16.mxu0 %v4087_v27 }
 0x128   : > { %1109 = vmatmul.mubr.f32.gmra.mrb[26].mxu1 %v920_v3  ;;  %3695 = vmatmul.mubr.f32.gmra.mrb[26].mxu0 %v940_v2  ;;  %v4129_v27 = vpack.c.bf16 %v1624_v15, %v1623_v14 }
 0x129   : > { %3697 = vmatprep.mubr.f32.mxu0 %v939_v4  ;;  %1113 = vmatprep.mubr.f32.mxu1 %v4451_v31  ;;  %v1657_v4 = vld [vmem:[%s6118_s7 + $0x110] sm:$0xff] }
 0x12a   : > { %4090 = vmatpush3.bf16.msra.mxu0 %v4089_v30  ;;  %4124 = vmatprep.subr.bf16.mxu1 %v4123_v47 }
 0x12b   : > { %4092 = vmatprep.subr.bf16.mxu0 %v4091_v34  ;;  %4126 = vmatpush3.bf16.msra.mxu1 %v4123_v47  ;;  %v1643_v34 = vld [vmem:[%s6118_s7 + $0xa0] sm:$0xff]  ;;  %v1628_v47 = vld [vmem:[%s6118_s7 + $0x28] sm:$0xff] }
 0x12c   : > { %1114 = vmatmul.mubr.f32.gmra.mrb[28].mxu1 %v919_v5  ;;  %3698 = vmatmul.mubr.f32.gmra.mrb[28].mxu0 %v948_v6  ;;  %v1658_v5 = vld [vmem:[%s6118_s7 + $0x118] sm:$0xff]  ;;  %v4135_v44 = vpack.c.bf16 %v1644_v36, %v1643_v34  ;;  %v1653_v34 = vld [vmem:[%s6118_s7 + $0xf0] sm:$0xff] }
 0x12d   : > { %4128 = vmatprep.subr.bf16.mxu1 %v4127_v54  ;;  %v4163_v9 = vpack.c.bf16 %v1658_v5, %v1657_v4  ;;  %v1645_v54 = vld [vmem:[%s6118_s7 + $0xb0] sm:$0xff]  ;;  %v1654_v36 = vld [vmem:[%s6118_s7 + $0xf8] sm:$0xff] }
 0x12e   : > { %4094 = vmatpush3.bf16.msra.mxu0 %v4093_v40 }
 0x12f   : > { %4160 = vmatprep.subr.bf16.mxu0 %v4159_v57 }
 0x1db   : > { %v3110_v58 = vpop.f32.mrb[10].mxu1 }
 0x1dc   : > { %v3111_v53 = vpop.f32.mrb[11].mxu1 }
 0x1dd   : > { %v3112_v51 = vadd.f32 %v3111_v53, %v3110_v58  ;;  %v4137_v58 = vpack.c.bf16 %v1628_v47, %v1627_v45  ;;  %v1668_v45 = vld [vmem:[%s6118_s7 + $0x168] sm:$0xff] }
 0x1df   : > { %v3113_v59 = vpop.f32.mrb[12].mxu1  ;;  %v1071_v63 = vadd.f32 %v3112_v51, %v5195_v61  ;;  %v4139_v51 = vpack.c.bf16 %v1646_v55, %v1645_v54  ;;  %v2064_v55 = vld [vmem:[%s6120_s9 + $0x200] sm:$0xff] }
 0x1e0   : > { %v3114_v60 = vpop.f32.mrb[13].mxu1  ;;  %v1629_v59 = vld [vmem:[%s6118_s7 + $0x30] sm:$0xff] }
 0x1e1   : > { %v1630_v60 = vld [vmem:[%s6118_s7 + $0x38] sm:$0xff] }
 0x1e3   : > { %v3116_v62 = vpop.f32.mrb[14].mxu1  ;;  %v3687_v17 = vpop.f32.mrb[20].mxu0 }
 0x1e4   : > { %v3117_v0 = vpop.f32.mrb[15].mxu1  ;;  %v1185_v1 = vpop.f32.mrb[21].mxu0  ;;  %v1648_v17 = vld [vmem:[%s6118_s7 + $0xc8] sm:$0xff] }
 0x1e5   : > { %v3118_v3 = vadd.f32 %v3117_v0, %v3116_v62  ;;  %v1186_v2 = vadd.f32 %v1185_v1, %v1071_v63  ;;  %v1647_v62 = vld [vmem:[%s6118_s7 + $0xc0] sm:$0xff] }
 0x1e6   : > { %v4143_v5 = vpack.c.bf16 %v1648_v17, %v1647_v62  ;;  %v5366_v17 = vld [vmem:[%s6117_s6] ss:$0 sm:$0xff] }
 0x1e7   : > { %v1234_v6 = vmax.f32 %v1186_v2, 0.0  ;;  %v3119_v7 = vpop.f32.mrb[16].mxu1  ;;  %v1081_v10 = vadd.f32 %v3118_v3, %v5195_v61  ;;  %v4141_v3 = vpack.c.bf16 %v1630_v60, %v1629_v59 }
 0x1e8   : > { %v3120_v8 = vpop.f32.mrb[17].mxu1  ;;  %v1632_v7 = vld [vmem:[%s6118_s7 + $0x48] sm:$0xff] }
 0x1e9   : > { %1405 = vmatprep.mubr.f32.mxu0 %v1234_v6 }
 0x1ea   : > { %1406 = vmatmul.mubr.f32.vlgmr.msra.gmra.mrb[30].mxu0 %v4451_v31 }
 0x1eb   : > { %v3122_v28 = vpop.f32.mrb[18].mxu1  ;;  %v3690_v35 = vpop.f32.mrb[22].mxu0  ;;  %1410 = vmatprep.mubr.f32.mxu0 %v4451_v31  ;;  %4162 = vmatpush3.bf16.msra.mxu0 %v4159_v57 }
 0x1ec   : > { %v3123_v11 = vpop.f32.mrb[19].mxu1  ;;  %v1195_v12 = vpop.f32.mrb[23].mxu0  ;;  %4164 = vmatprep.subr.bf16.mxu0 %v4163_v9 }
 0x1ed   : > { %v3124_v18 = vadd.f32 %v3123_v11, %v3122_v28  ;;  %v1196_v19 = vadd.f32 %v1195_v12, %v1081_v10 }
 0x1ee   : > { %1411 = vmatmul.mubr.f32.gmra.mrb[32].mxu0 %v4451_v31 }
 0x1ef   : > { %v1236_v25 = vmax.f32 %v1196_v19, 0.0  ;;  %v3125_v26 = vpop.f32.mrb[20].mxu1  ;;  %4166 = vmatpush3.bf16.msra.mxu0 %v4163_v9  ;;  %v1091_v40 = vadd.f32 %v3124_v18, %v5195_v61  ;;  %v1633_v19 = vld [vmem:[%s6118_s7 + $0x50] sm:$0xff] }
 0x1f0   : > { %v3126_v30 = vpop.f32.mrb[21].mxu1  ;;  %4168 = vmatprep.subr.bf16.mxu0 %v4167_v16  ;;  %v4149_v23 = vpack.c.bf16 %v1634_v22, %v1633_v19  ;;  %v1651_v26 = vld [vmem:[%s6118_s7 + $0xe0] sm:$0xff]  ;;  %v2049_v19 = vld [vmem:[%s6120_s9 + $0x188] sm:$0xff] }
 0x1f1   : > { %1415 = vmatprep.mubr.f32.mxu0 %v1236_v25  ;;  %3732 = vmatprep.mubr.f32.mxu1 %v1236_v25 }
 0x1f2   : > { %1416 = vmatmul.mubr.f32.gmra.mrb[34].mxu0 %v1234_v6  ;;  %3733 = vmatmul.mubr.f32.vlgmr.msra.gmra.mrb[30].mxu1 %v4451_v31  ;;  %v1631_v6 = vld [vmem:[%s6118_s7 + $0x40] sm:$0xff] }
 0x1f3   : > { %v3128_v38 = vpop.f32.mrb[22].mxu1  ;;  %v3693_v39 = vpop.f32.mrb[24].mxu0  ;;  %1420 = vmatprep.mubr.f32.mxu0 %v4451_v31  ;;  %4130 = vmatpush3.bf16.msra.mxu1 %v4129_v27  ;;  %v4145_v10 = vpack.c.bf16 %v1632_v7, %v1631_v6  ;;  %v1652_v27 = vld [vmem:[%s6118_s7 + $0xe8] sm:$0xff] }
 0x1f4   : > { %v3129_v42 = vpop.f32.mrb[23].mxu1  ;;  %v1205_v43 = vpop.f32.mrb[25].mxu0  ;;  %4132 = vmatprep.subr.bf16.mxu1 %v4131_v33  ;;  %4170 = vmatpush3.bf16.msra.mxu0 %v4167_v16  ;;  %v1650_v16 = vld [vmem:[%s6118_s7 + $0xd8] sm:$0xff]  ;;  %v4151_v30 = vpack.c.bf16 %v1652_v27, %v1651_v26  ;;  %v1635_v33 = vld [vmem:[%s6118_s7 + $0x60] sm:$0xff]  ;;  %v2086_v26 = vld [vmem:[%s6120_s9 + $0x2b0] sm:$0xff] }
 0x1f5   : > { %v3130_v49 = vadd.f32 %v3129_v42, %v3128_v38  ;;  %v1206_v50 = vadd.f32 %v1205_v43, %v1091_v40  ;;  %4172 = vmatprep.subr.bf16.mxu0 %v4171_v37  ;;  %v4153_v52 = vpack.c.bf16 %v1636_v48, %v1635_v33  ;;  %v4155_v38 = vpack.c.bf16 %v1654_v36, %v1653_v34  ;;  %v1666_v39 = vld [vmem:[%s6118_s7 + $0x158] sm:$0xff]  ;;  %v1637_v40 = vld [vmem:[%s6118_s7 + $0x70] sm:$0xff] }
 0x1f6   : > { %1421 = vmatmul.mubr.f32.gmra.mrb[36].mxu0 %v4451_v31  ;;  %v2087_v27 = vld [vmem:[%s6120_s9 + $0x2b8] sm:$0xff]  ;;  %v2050_v36 = vld [vmem:[%s6120_s9 + $0x190] sm:$0xff] }
 0x1f7   : > { %v1238_v56 = vmax.f32 %v1206_v50, 0.0  ;;  %v3131_v57 = vpop.f32.mrb[24].mxu1  ;;  %4134 = vmatpush3.bf16.msra.mxu1 %v4133_v41  ;;  %v1101_v1 = vadd.f32 %v3130_v49, %v5195_v61  ;;  %v1638_v41 = vld [vmem:[%s6118_s7 + $0x78] sm:$0xff]  ;;  %v1669_v49 = vld [vmem:[%s6118_s7 + $0x170] sm:$0xff] }
 0x1f8   : > { %v3132_v53 = vpop.f32.mrb[25].mxu1  ;;  %4136 = vmatprep.subr.bf16.mxu1 %v4135_v44  ;;  %4174 = vmatpush3.bf16.msra.mxu0 %v4171_v37  ;;  %v1665_v37 = vld [vmem:[%s6118_s7 + $0x150] sm:$0xff]  ;;  %v4157_v43 = vpack.c.bf16 %v1638_v41, %v1637_v40  ;;  %v1667_v44 = vld [vmem:[%s6118_s7 + $0x160] sm:$0xff]  ;;  %v1670_v50 = vld [vmem:[%s6118_s7 + $0x178] sm:$0xff]  ;;  %v4235_v40 = vpack.c.bf16 %v2087_v27, %v2086_v26 }
 0x1f9   : > { %1425 = vmatprep.mubr.f32.mxu0 %v1238_v56  ;;  %3735 = vmatprep.mubr.f32.mxu1 %v1238_v56  ;;  %v4179_v42 = vpack.c.bf16 %v1666_v39, %v1665_v37  ;;  %v4183_v47 = vpack.c.bf16 %v1668_v45, %v1667_v44  ;;  %v4187_v54 = vpack.c.bf16 %v1670_v50, %v1669_v49  ;;  %v2080_v57 = vld [vmem:[%s6120_s9 + $0x280] sm:$0xff]  ;;  %v2081_v53 = vld [vmem:[%s6120_s9 + $0x288] sm:$0xff]  ;;  %v2051_v37 = vld [vmem:[%s6120_s9 + $0x198] sm:$0xff] }
 0x1fa   : > { %1426 = vmatmul.mubr.f32.gmra.mrb[38].mxu0 %v1236_v25  ;;  %3736 = vmatmul.mubr.f32.gmra.mrb[32].mxu1 %v4451_v31  ;;  %v4175_v25 = vpack.c.bf16 %v1664_v24, %v1663_v21  ;;  %v2066_v24 = vld [vmem:[%s6120_s9 + $0x210] sm:$0xff]  ;;  %v2069_v39 = vld [vmem:[%s6120_s9 + $0x228] sm:$0xff]  ;;  %v4197_v44 = vpack.c.bf16 %v2051_v37, %v2050_v36  ;;  %v2052_v50 = vld [vmem:[%s6120_s9 + $0x1a0] sm:$0xff] }
 0x1fb   : > { %v3134_v63 = vpop.f32.mrb[26].mxu1  ;;  %v3696_v0 = vpop.f32.mrb[26].mxu0  ;;  %1430 = vmatprep.mubr.f32.mxu0 %v4451_v31  ;;  %4138 = vmatpush3.bf16.msra.mxu1 %v4137_v58  ;;  %v2058_v26 = vld [vmem:[%s6120_s9 + $0x1d0] sm:$0xff]  ;;  %v2059_v27 = vld [vmem:[%s6120_s9 + $0x1d8] sm:$0xff]  ;;  %v2061_v36 = vld [vmem:[%s6120_s9 + $0x1e8] sm:$0xff] }
 0x1fc   : > { %v3135_v2 = vpop.f32.mrb[27].mxu1  ;;  %v1215_v4 = vpop.f32.mrb[27].mxu0  ;;  %4140 = vmatprep.subr.bf16.mxu1 %v4139_v51  ;;  %4176 = vmatprep.subr.bf16.mxu0 %v4175_v25  ;;  %v4223_v51 = vpack.c.bf16 %v2081_v53, %v2080_v57  ;;  %v2070_v57 = vld [vmem:[%s6120_s9 + $0x230] sm:$0xff] }
 0x1fd   : > { %v3136_v8 = vadd.f32 %v3135_v2, %v3134_v63  ;;  %v1216_v9 = vadd.f32 %v1215_v4, %v1101_v1  ;;  %4178 = vmatpush3.bf16.msra.mxu0 %v4175_v25  ;;  %v2067_v25 = vld [vmem:[%s6120_s9 + $0x218] sm:$0xff] }
 0x1fe   : > { %1431 = vmatmul.mubr.f32.gmra.mrb[40].mxu0 %v4451_v31  ;;  %4180 = vmatprep.subr.bf16.mxu0 %v4179_v42  ;;  %v4195_v34 = vpack.c.bf16 %v2067_v25, %v2066_v24  ;;  %v2089_v24 = vld [vmem:[%s6120_s9 + $0x2c8] sm:$0xff] }
 0x1ff   : > { %v1240_v13 = vmax.f32 %v1216_v9, 0.0  ;;  %v3137_v20 = vpop.f32.mrb[28].mxu1  ;;  %v3699_v28 = vpop.f32.mrb[28].mxu0  ;;  %v1111_v35 = vadd.f32 %v3136_v8, %v5195_v61  ;;  %4142 = vmatpush3.bf16.msra.mxu1 %v4141_v3  ;;  %v1649_v61 = vld [vmem:[%s6118_s7 + $0xd0] sm:$0xff]  ;;  %v2083_v9 = vld [vmem:[%s6120_s9 + $0x298] sm:$0xff] }
 0x200   : > { %v3138_v11 = vpop.f32.mrb[29].mxu1  ;;  %v1225_v12 = vpop.f32.mrb[29].mxu0  ;;  %4144 = vmatprep.subr.bf16.mxu1 %v4143_v5  ;;  %v4147_v18 = vpack.c.bf16 %v1650_v16, %v1649_v61  ;;  %v2082_v8 = vld [vmem:[%s6120_s9 + $0x290] sm:$0xff] }
 0x201   : > { %v1226_v14 = vadd.f32 %v1225_v12, %v1111_v35  ;;  %1435 = vmatprep.mubr.f32.mxu0 %v1240_v13  ;;  %3738 = vmatprep.mubr.f32.mxu1 %v1240_v13  ;;  %v4227_v35 = vpack.c.bf16 %v2083_v9, %v2082_v8  ;;  %v2085_v11 = vld [vmem:[%s6120_s9 + $0x2a8] sm:$0xff] }
 0x202   : > { %1436 = vmatmul.mubr.f32.gmra.mrb[42].mxu0 %v1238_v56  ;;  %3739 = vmatmul.mubr.f32.gmra.mrb[34].mxu1 %v4451_v31  ;;  %v2065_v56 = vld [vmem:[%s6120_s9 + $0x208] sm:$0xff] }
 0x203   : > { %v1242_v15 = vmax.f32 %v1226_v14, 0.0  ;;  %1440 = vmatprep.mubr.f32.mxu0 %v4451_v31  ;;  %4146 = vmatpush3.bf16.msra.mxu1 %v4145_v10  ;;  %v4191_v58 = vpack.c.bf16 %v2065_v56, %v2064_v55  ;;  %v2084_v10 = vld [vmem:[%s6120_s9 + $0x2a0] sm:$0xff] }
 0x204   : > { %4148 = vmatprep.subr.bf16.mxu1 %v4147_v18  ;;  %4182 = vmatpush3.bf16.msra.mxu0 %v4179_v42  ;;  %v2048_v18 = vld [vmem:[%s6120_s9 + $0x180] sm:$0xff]  ;;  %v4231_v22 = vpack.c.bf16 %v2085_v11, %v2084_v10  ;;  %v2057_v11 = vld [vmem:[%s6120_s9 + $0x1c8] sm:$0xff] }
 0x205   : > { %3741 = vmatprep.mubr.f32.mxu1 %v1242_v15  ;;  %4184 = vmatprep.subr.bf16.mxu0 %v4183_v47  ;;  %v4193_v48 = vpack.c.bf16 %v2049_v19, %v2048_v18  ;;  %v2056_v10 = vld [vmem:[%s6120_s9 + $0x1c0] sm:$0xff] }
 0x206   : > { %1441 = vmatmul.mubr.f32.gmra.mrb[44].mxu0 %v4451_v31  ;;  %3742 = vmatmul.mubr.f32.gmra.mrb[36].mxu1 %v4451_v31 }
 0x207   : > { %1445 = vmatprep.mubr.f32.mxu0 %v1242_v15  ;;  %3744 = vmatprep.mubr.f32.mxu1 %v4451_v31 }
 0x208   : > { %4150 = vmatpush3.bf16.msra.mxu1 %v4149_v23  ;;  %4186 = vmatpush3.bf16.msra.mxu0 %v4183_v47 }
 0x209   : > { %4152 = vmatprep.subr.bf16.mxu1 %v4151_v30  ;;  %4188 = vmatprep.subr.bf16.mxu0 %v4187_v54 }
 0x20a   : > { %1446 = vmatmul.mubr.f32.gmra.mrb[46].mxu0 %v1240_v13  ;;  %3745 = vmatmul.mubr.f32.gmra.mrb[38].mxu1 %v4451_v31 }
 0x20b   : > { %1450 = vmatprep.mubr.f32.mxu0 %v4451_v31 }
 0x20c   : > { %4154 = vmatpush3.bf16.msra.mxu1 %v4153_v52  ;;  %4190 = vmatpush3.bf16.msra.mxu0 %v4187_v54  ;;  %v2053_v54 = vld [vmem:[%s6120_s9 + $0x1a8] sm:$0xff] }
 0x20d   : > { %4156 = vmatprep.subr.bf16.mxu1 %v4155_v38  ;;  %4192 = vmatprep.subr.bf16.mxu0 %v4191_v58  ;;  %v2068_v38 = vld [vmem:[%s6120_s9 + $0x220] sm:$0xff]  ;;  %v2071_v58 = vld [vmem:[%s6120_s9 + $0x238] sm:$0xff] }
 0x20e   : > { %1451 = vmatmul.mubr.f32.gmra.mrb[48].mxu0 %v4451_v31  ;;  %v4199_v49 = vpack.c.bf16 %v2069_v39, %v2068_v38  ;;  %v2090_v38 = vld [vmem:[%s6120_s9 + $0x2d0] sm:$0xff]  ;;  %v2091_v39 = vld [vmem:[%s6120_s9 + $0x2d8] sm:$0xff] }
 0x210   : > { %4158 = vmatpush3.bf16.msra.mxu1 %v4157_v43 }
 0x211   : > { %4224 = vmatprep.subr.bf16.mxu1 %v4223_v51 }
 0x2bd   : > { %v3198_v59 = vpop.f32.mrb[30].mxu0 }
 0x2be   : > { %v3199_v60 = vpop.f32.mrb[31].mxu0 }
 0x2bf   : > { %v3200_v62 = vadd.f32 %v3199_v60, %v3198_v59 }
 0x2c1   : > { %v3201_v63 = vpop.f32.mrb[32].mxu0  ;;  %v1408_v1 = vadd.f32 %v3200_v62, %v5366_v17  ;;  %v4201_v62 = vpack.c.bf16 %v2053_v54, %v2052_v50  ;;  %v2093_v50 = vld [vmem:[%s6120_s9 + $0x2e8] sm:$0xff] }
 0x2c2   : > { %v3202_v0 = vpop.f32.mrb[33].mxu0 }
 0x2c5   : > { %v3204_v3 = vpop.f32.mrb[34].mxu0  ;;  %v3734_v2 = vpop.f32.mrb[30].mxu1 }
 0x2c6   : > { %v3205_v4 = vpop.f32.mrb[35].mxu0  ;;  %v1522_v5 = vpop.f32.mrb[31].mxu1  ;;  %v2055_v2 = vld [vmem:[%s6120_s9 + $0x1b8] sm:$0xff] }
 0x2c7   : > { %v3206_v6 = vadd.f32 %v3205_v4, %v3204_v3  ;;  %v1523_v7 = vadd.f32 %v1522_v5, %v1408_v1  ;;  %v4203_v1 = vpack.c.bf16 %v2071_v58, %v2070_v57  ;;  %v2054_v3 = vld [vmem:[%s6120_s9 + $0x1b0] sm:$0xff]  ;;  %v2072_v5 = vld [vmem:[%s6120_s9 + $0x240] sm:$0xff] }
 0x2c8   : > { %v2622_v58 = vld [vmem:[%s6120_s9 + $0x380] sm:$0xff] }
 0x2c9   : > { %v1571_v13 = vmax.f32 %v1523_v7, 0.0  ;;  %v3207_v20 = vpop.f32.mrb[36].mxu0  ;;  %v1418_v15 = vadd.f32 %v3206_v6, %v5366_v17  ;;  %v2073_v6 = vld [vmem:[%s6120_s9 + $0x248] sm:$0xff] }
 0x2ca   : > { %v3208_v28 = vpop.f32.mrb[37].mxu0 }
 0x2cb   : > { %1742 = vmatprep.mubr.f32.mxu1 %v1571_v13 }
 0x2cc   : > { %1743 = vmatmul.mubr.f32.vlgmr.msra.gmra.mrb[40].mxu1 %v4451_v31 }
 0x2cd   : > { %v3210_v12 = vpop.f32.mrb[38].mxu0  ;;  %v3737_v14 = vpop.f32.mrb[32].mxu1  ;;  %1747 = vmatprep.mubr.f32.mxu1 %v4451_v31  ;;  %4226 = vmatpush3.bf16.msra.mxu1 %v4223_v51 }
 0x2ce   : > { %v3211_v61 = vpop.f32.mrb[39].mxu0  ;;  %v1532_v16 = vpop.f32.mrb[33].mxu1  ;;  %4228 = vmatprep.subr.bf16.mxu1 %v4227_v35 }
 0x2cf   : > { %v3212_v23 = vadd.f32 %v3211_v61, %v3210_v12  ;;  %v1533_v21 = vadd.f32 %v1532_v16, %v1418_v15  ;;  %v4209_v15 = vpack.c.bf16 %v2057_v11, %v2056_v10 }
 0x2d0   : > { %1748 = vmatmul.mubr.f32.gmra.mrb[42].mxu1 %v4451_v31 }
 0x2d1   : > { %v1573_v30 = vmax.f32 %v1533_v21, 0.0  ;;  %v3213_v33 = vpop.f32.mrb[40].mxu0  ;;  %4230 = vmatpush3.bf16.msra.mxu1 %v4227_v35  ;;  %v1428_v43 = vadd.f32 %v3212_v23, %v5366_v17  ;;  %v4207_v35 = vpack.c.bf16 %v2073_v6, %v2072_v5  ;;  %v2088_v23 = vld [vmem:[%s6120_s9 + $0x2c0] sm:$0xff] }
 0x2d2   : > { %v3214_v52 = vpop.f32.mrb[41].mxu0  ;;  %4232 = vmatprep.subr.bf16.mxu1 %v4231_v22  ;;  %v4239_v25 = vpack.c.bf16 %v2089_v24, %v2088_v23  ;;  %v2076_v33 = vld [vmem:[%s6120_s9 + $0x260] sm:$0xff] }
 0x2d3   : > { %1752 = vmatprep.mubr.f32.mxu1 %v1573_v30  ;;  %3779 = vmatprep.mubr.f32.mxu0 %v1573_v30 }
 0x2d4   : > { %1753 = vmatmul.mubr.f32.gmra.mrb[44].mxu1 %v1571_v13  ;;  %3780 = vmatmul.mubr.f32.vlgmr.msra.gmra.mrb[50].mxu0 %v4451_v31  ;;  %v4205_v13 = vpack.c.bf16 %v2055_v2, %v2054_v3 }
 0x2d5   : > { %v3216_v41 = vpop.f32.mrb[42].mxu0  ;;  %v3740_v42 = vpop.f32.mrb[34].mxu1  ;;  %1757 = vmatprep.mubr.f32.mxu1 %v4451_v31  ;;  %4194 = vmatpush3.bf16.msra.mxu0 %v4193_v48  ;;  %v2077_v48 = vld [vmem:[%s6120_s9 + $0x268] sm:$0xff] }
 0x2d6   : > { %v3217_v45 = vpop.f32.mrb[43].mxu0  ;;  %v1542_v47 = vpop.f32.mrb[35].mxu1  ;;  %4196 = vmatprep.subr.bf16.mxu0 %v4195_v34  ;;  %4234 = vmatpush3.bf16.msra.mxu1 %v4231_v22  ;;  %v2075_v22 = vld [vmem:[%s6120_s9 + $0x258] sm:$0xff]  ;;  %v4215_v52 = vpack.c.bf16 %v2077_v48, %v2076_v33  ;;  %v2060_v34 = vld [vmem:[%s6120_s9 + $0x1e0] sm:$0xff] }
 0x2d7   : > { %v3218_v55 = vadd.f32 %v3217_v45, %v3216_v41  ;;  %v1543_v56 = vadd.f32 %v1542_v47, %v1428_v43  ;;  %4236 = vmatprep.subr.bf16.mxu1 %v4235_v40  ;;  %v4217_v37 = vpack.c.bf16 %v2061_v36, %v2060_v34  ;;  %v2078_v41 = vld [vmem:[%s6120_s9 + $0x270] sm:$0xff]  ;;  %v2079_v42 = vld [vmem:[%s6120_s9 + $0x278] sm:$0xff] }
 0x2d8   : > { %1758 = vmatmul.mubr.f32.gmra.mrb[46].mxu1 %v4451_v31  ;;  %v4219_v43 = vpack.c.bf16 %v2079_v42, %v2078_v41  ;;  %v2063_v45 = vld [vmem:[%s6120_s9 + $0x1f8] sm:$0xff] }
 0x2d9   : > { %v1575_v53 = vmax.f32 %v1543_v56, 0.0  ;;  %v3743_v51 = vpop.f32.mrb[36].mxu1  ;;  %v1438_v59 = vadd.f32 %v3218_v55, %v5366_v17  ;;  %v3219_v60 = vpop.f32.mrb[44].mxu0  ;;  %4198 = vmatpush3.bf16.msra.mxu0 %v4197_v44  ;;  %v2062_v44 = vld [vmem:[%s6120_s9 + $0x1f0] sm:$0xff]  ;;  %v2095_v56 = vld [vmem:[%s6120_s9 + $0x2f8] sm:$0xff] }
 0x2da   : > { %v1552_v63 = vpop.f32.mrb[37].mxu1  ;;  %v3220_v0 = vpop.f32.mrb[45].mxu0  ;;  %4200 = vmatprep.subr.bf16.mxu0 %v4199_v49  ;;  %4238 = vmatpush3.bf16.msra.mxu1 %v4235_v40  ;;  %v4243_v40 = vpack.c.bf16 %v2091_v39, %v2090_v38  ;;  %v4221_v47 = vpack.c.bf16 %v2063_v45, %v2062_v44  ;;  %v2092_v49 = vld [vmem:[%s6120_s9 + $0x2e0] sm:$0xff]  ;;  %v2094_v55 = vld [vmem:[%s6120_s9 + $0x2f0] sm:$0xff]  ;;  %v2005_v60 = vld [vmem:[%s6120_s9 + $0x88] sm:$0xff] }
 0x2db   : > { %v1553_v4 = vadd.f32 %v1552_v63, %v1438_v59  ;;  %1762 = vmatprep.mubr.f32.mxu1 %v1575_v53  ;;  %3782 = vmatprep.mubr.f32.mxu0 %v1575_v53  ;;  %v4247_v54 = vpack.c.bf16 %v2093_v50, %v2092_v49  ;;  %v4251_v57 = vpack.c.bf16 %v2095_v56, %v2094_v55  ;;  %v2004_v59 = vld [vmem:[%s6120_s9 + $0x80] sm:$0xff]  ;;  %v1989_v38 = vld [vmem:[%s6120_s9 + $0x8] sm:$0xff]  ;;  %v2006_v39 = vld [vmem:[%s6120_s9 + $0x90] sm:$0xff] }
 0x2dc   : > { %1763 = vmatmul.mubr.f32.gmra.mrb[48].mxu1 %v1573_v30  ;;  %3783 = vmatmul.mubr.f32.gmra.mrb[52].mxu0 %v4451_v31  ;;  %v4213_v30 = vpack.c.bf16 %v2059_v27, %v2058_v26  ;;  %v2626_v27 = vld [vmem:[%s6120_s9 + $0x3a0] sm:$0xff]  ;;  %v2611_v50 = vld [vmem:[%s6120_s9 + $0x328] sm:$0xff] }
 0x2dd   : > { %v1577_v7 = vmax.f32 %v1553_v4, 0.0  ;;  %v3222_v8 = vpop.f32.mrb[46].mxu0  ;;  %1767 = vmatprep.mubr.f32.mxu1 %v4451_v31  ;;  %v3746_v9 = vpop.f32.mrb[38].mxu1  ;;  %4202 = vmatpush3.bf16.msra.mxu0 %v4201_v62  ;;  %v4255_v62 = vpack.c.bf16 %v2005_v60, %v2004_v59  ;;  %v5537_v4 = vld [vmem:[%s6119_s8] ss:$0 sm:$0xff]  ;;  %v1990_v59 = vld [vmem:[%s6120_s9 + $0x10] sm:$0xff] }
 0x2de   : > { %v3223_v20 = vpop.f32.mrb[47].mxu0  ;;  %v1562_v28 = vpop.f32.mrb[39].mxu1  ;;  %4204 = vmatprep.subr.bf16.mxu0 %v4203_v1  ;;  %4240 = vmatprep.subr.bf16.mxu1 %v4239_v25  ;;  %v2610_v49 = vld [vmem:[%s6120_s9 + $0x320] sm:$0xff]  ;;  %v1991_v60 = vld [vmem:[%s6120_s9 + $0x18] sm:$0xff] }
 0x2df   : > { %v3224_v12 = vadd.f32 %v3223_v20, %v3222_v8  ;;  %3785 = vmatprep.mubr.f32.mxu0 %v1577_v7  ;;  %4242 = vmatpush3.bf16.msra.mxu1 %v4239_v25 }
 0x2e0   : > { %1768 = vmatmul.mubr.f32.gmra.mrb[50].mxu1 %v4451_v31  ;;  %3786 = vmatmul.mubr.f32.gmra.mrb[54].mxu0 %v4451_v31 }
 0x2e1   : > { %1772 = vmatprep.mubr.f32.mxu1 %v1577_v7  ;;  %v1448_v14 = vadd.f32 %v3224_v12, %v5366_v17  ;;  %4206 = vmatpush3.bf16.msra.mxu0 %v4205_v13  ;;  %v3225_v61 = vpop.f32.mrb[48].mxu0  ;;  %v2074_v17 = vld [vmem:[%s6120_s9 + $0x250] sm:$0xff] }
 0x2e2   : > { %4208 = vmatprep.subr.bf16.mxu0 %v4207_v35  ;;  %v3226_v16 = vpop.f32.mrb[49].mxu0  ;;  %v4211_v21 = vpack.c.bf16 %v2075_v22, %v2074_v17  ;;  %4244 = vmatprep.subr.bf16.mxu1 %v4243_v40  ;;  %v2607_v35 = vld [vmem:[%s6120_s9 + $0x308] sm:$0xff]  ;;  %v2624_v12 = vld [vmem:[%s6120_s9 + $0x390] sm:$0xff]  ;;  %v2609_v22 = vld [vmem:[%s6120_s9 + $0x318] sm:$0xff] }
 0x2e3   : > { %v1563_v18 = vadd.f32 %v1562_v28, %v1448_v14  ;;  %4246 = vmatpush3.bf16.msra.mxu1 %v4243_v40  ;;  %v2606_v28 = vld [vmem:[%s6120_s9 + $0x300] sm:$0xff]  ;;  %v2625_v14 = vld [vmem:[%s6120_s9 + $0x398] sm:$0xff]  ;;  %v2608_v17 = vld [vmem:[%s6120_s9 + $0x310] sm:$0xff] }
 0x2e4   : > { %1773 = vmatmul.mubr.f32.gmra.mrb[52].mxu1 %v1575_v53  ;;  %4248 = vmatprep.subr.bf16.mxu1 %v4247_v54  ;;  %v2623_v53 = vld [vmem:[%s6120_s9 + $0x388] sm:$0xff]  ;;  %v4325_v36 = vpack.c.bf16 %v2609_v22, %v2608_v17 }
 0x2e5   : > { %v1579_v19 = vmax.f32 %v1563_v18, 0.0  ;;  %1777 = vmatprep.mubr.f32.mxu1 %v4451_v31  ;;  %4210 = vmatpush3.bf16.msra.mxu0 %v4209_v15  ;;  %v4319_v51 = vpack.c.bf16 %v2623_v53, %v2622_v58  ;;  %v4321_v18 = vpack.c.bf16 %v2607_v35, %v2606_v28  ;;  %v4261_v28 = vpack.c.bf16 %v1991_v60, %v1990_v59 }
 0x2e6   : > { %4212 = vmatprep.subr.bf16.mxu0 %v4211_v21 }
 0x2e7   : > { %3788 = vmatprep.mubr.f32.mxu0 %v1579_v19  ;;  %4250 = vmatpush3.bf16.msra.mxu1 %v4247_v54 }
 0x2e8   : > { %1778 = vmatmul.mubr.f32.gmra.mrb[54].mxu1 %v4451_v31  ;;  %3789 = vmatmul.mubr.f32.gmra.mrb[56].mxu0 %v4451_v31 }
 0x2e9   : > { %1782 = vmatprep.mubr.f32.mxu1 %v1579_v19  ;;  %3791 = vmatprep.mubr.f32.mxu0 %v4451_v31  ;;  %v4323_v19 = vpack.c.bf16 %v2625_v14, %v2624_v12  ;;  %v1992_v12 = vld [vmem:[%s6120_s9 + $0x20] sm:$0xff]  ;;  %v1993_v14 = vld [vmem:[%s6120_s9 + $0x28] sm:$0xff] }
 0x2ea   : > { %4214 = vmatpush3.bf16.msra.mxu0 %v4213_v30  ;;  %4252 = vmatprep.subr.bf16.mxu1 %v4251_v57  ;;  %v2627_v30 = vld [vmem:[%s6120_s9 + $0x3a8] sm:$0xff] }
 0x2eb   : > { %4216 = vmatprep.subr.bf16.mxu0 %v4215_v52  ;;  %4254 = vmatpush3.bf16.msra.mxu1 %v4251_v57  ;;  %v4327_v40 = vpack.c.bf16 %v2627_v30, %v2626_v27  ;;  %v2612_v27 = vld [vmem:[%s6120_s9 + $0x330] sm:$0xff]  ;;  %v2613_v30 = vld [vmem:[%s6120_s9 + $0x338] sm:$0xff] }
 0x2ec   : > { %1783 = vmatmul.mubr.f32.gmra.mrb[56].mxu1 %v1577_v7  ;;  %3792 = vmatmul.mubr.f32.gmra.mrb[58].mxu0 %v4451_v31 }
 0x2ed   : > { %1787 = vmatprep.mubr.f32.mxu1 %v4451_v31  ;;  %4256 = vmatprep.subr.bf16.mxu1 %v4255_v62  ;;  %v4329_v62 = vpack.c.bf16 %v2611_v50, %v2610_v49 }
 0x2ee   : > { %4218 = vmatpush3.bf16.msra.mxu0 %v4217_v37  ;;  %v1988_v37 = vld [vmem:[%s6120_s9] sm:$0xff] }
 0x2ef   : > { %4220 = vmatprep.subr.bf16.mxu0 %v4219_v43  ;;  %v4257_v53 = vpack.c.bf16 %v1989_v38, %v1988_v37  ;;  %v4265_v37 = vpack.c.bf16 %v1993_v14, %v1992_v12  ;;  %v2014_v12 = vld [vmem:[%s6120_s9 + $0xd0] sm:$0xff] }
 0x2f0   : > { %1788 = vmatmul.mubr.f32.gmra.mrb[58].mxu1 %v4451_v31 }
 0x2f2   : > { %4222 = vmatpush3.bf16.msra.mxu0 %v4221_v47  ;;  %v2007_v47 = vld [vmem:[%s6120_s9 + $0x98] sm:$0xff] }
 0x2f3   : > { %4320 = vmatprep.subr.bf16.mxu0 %v4319_v51  ;;  %v4259_v51 = vpack.c.bf16 %v2007_v47, %v2006_v39  ;;  %v4333_v39 = vpack.c.bf16 %v2613_v30, %v2612_v27  ;;  %v1998_v27 = vld [vmem:[%s6120_s9 + $0x50] sm:$0xff]  ;;  %v1999_v30 = vld [vmem:[%s6120_s9 + $0x58] sm:$0xff] }
 0x39f   : > { %v3286_v63 = vpop.f32.mrb[40].mxu1 }
 0x3a0   : > { %v3287_v0 = vpop.f32.mrb[41].mxu1 }
 0x3a1   : > { %v3288_v1 = vadd.f32 %v3287_v0, %v3286_v63  ;;  %v2008_v63 = vld [vmem:[%s6120_s9 + $0xa0] sm:$0xff] }
 0x3a3   : > { %v3289_v3 = vpop.f32.mrb[42].mxu1  ;;  %v1745_v7 = vadd.f32 %v3288_v1, %v5537_v4 }
 0x3a4   : > { %v3290_v2 = vpop.f32.mrb[43].mxu1 }
 0x3a7   : > { %v3292_v5 = vpop.f32.mrb[44].mxu1  ;;  %v3781_v6 = vpop.f32.mrb[50].mxu0 }
 0x3a8   : > { %v3293_v8 = vpop.f32.mrb[45].mxu1  ;;  %v1859_v9 = vpop.f32.mrb[51].mxu0  ;;  %v2009_v6 = vld [vmem:[%s6120_s9 + $0xa8] sm:$0xff] }
 0x3a9   : > { %v3294_v13 = vadd.f32 %v3293_v8, %v3292_v5  ;;  %v1860_v20 = vadd.f32 %v1859_v9, %v1745_v7  ;;  %v2628_v7 = vld [vmem:[%s6120_s9 + $0x3b0] sm:$0xff]  ;;  %v2629_v8 = vld [vmem:[%s6120_s9 + $0x3b8] sm:$0xff] }
 0x3ab   : > { %v5546_v10 = vmax.f32 %v1860_v20, 0.0  ;;  %v3295_v11 = vpop.f32.mrb[46].mxu1  ;;  %v1755_v24 = vadd.f32 %v3294_v13, %v5537_v4 }
 0x3ac   : > { %v3296_v15 = vpop.f32.mrb[47].mxu1  ;;  %v4263_v11 = vpack.c.bf16 %v2009_v6, %v2008_v63  ;;  %v2633_v63 = vld [vmem:[%s6120_s9 + $0x3d8] sm:$0xff] }
 0x3ad   : > { %v1950_v61 = vrot.slane %v5546_v10, 7  ;;  %2160 = vmatprep.mubr.f32.mxu0 %v5546_v10  ;;  %v1970_v16 = vrot.slane %v5546_v10, 1  ;;  %v4331_v15 = vpack.c.bf16 %v2629_v8, %v2628_v7  ;;  %v1996_v7 = vld [vmem:[%s6120_s9 + $0x40] sm:$0xff]  ;;  %v1997_v8 = vld [vmem:[%s6120_s9 + $0x48] sm:$0xff] }
 0x3af   : > { %v3298_v23 = vpop.f32.mrb[48].mxu1  ;;  %v3784_v21 = vpop.f32.mrb[52].mxu0  ;;  %v5567_v25 = vsel %vm552_vm1, %v4961_v32, %v1950_v61  ;;  %v5574_v26 = vsel %vm573_vm0, %v1970_v16, %v4964_v29  ;;  %v5600_v44 = vsel %vm552_vm1, %v1950_v61, %v4961_v32  ;;  %v2010_v61 = vld [vmem:[%s6120_s9 + $0xb0] sm:$0xff] }
 0x3b0   : > { %v3299_v33 = vpop.f32.mrb[49].mxu1  ;;  %v1869_v48 = vpop.f32.mrb[53].mxu0  ;;  %2161 = vmatmul.mubr.f32.vlgmr.msra.gmra.mrb[60].mxu0 %v5567_v25  ;;  %3826 = vmatprep.mubr.f32.mxu1 %v5574_v26 }
 0x3b1   : > { %v3300_v52 = vadd.f32 %v3299_v33, %v3298_v23  ;;  %v1870_v34 = vadd.f32 %v1869_v48, %v1755_v24  ;;  %2165 = vmatprep.mubr.f32.mxu0 %v4451_v31  ;;  %4322 = vmatpush3.bf16.msra.mxu0 %v4321_v18  ;;  %v2011_v24 = vld [vmem:[%s6120_s9 + $0xb8] sm:$0xff] }
 0x3b2   : > { %4324 = vmatprep.subr.bf16.mxu0 %v4323_v19  ;;  %v4267_v38 = vpack.c.bf16 %v2011_v24, %v2010_v61  ;;  %v2616_v61 = vld [vmem:[%s6120_s9 + $0x350] sm:$0xff] }
 0x3b3   : > { %v5594_v41 = vmax.f32 %v1870_v34, 0.0  ;;  %v3787_v42 = vpop.f32.mrb[54].mxu0  ;;  %v1765_v43 = vadd.f32 %v3300_v52, %v5537_v4  ;;  %v3301_v45 = vpop.f32.mrb[50].mxu1  ;;  %v2630_v52 = vld [vmem:[%s6120_s9 + $0x3c0] sm:$0xff]  ;;  %v2631_v34 = vld [vmem:[%s6120_s9 + $0x3c8] sm:$0xff] }
 0x3b4   : > { %v1879_v54 = vpop.f32.mrb[55].mxu0  ;;  %2166 = vmatmul.mubr.f32.gmra.mrb[62].mxu0 %v5600_v44  ;;  %v3302_v55 = vpop.f32.mrb[51].mxu1  ;;  %v1995_v42 = vld [vmem:[%s6120_s9 + $0x38] sm:$0xff] }
 0x3b5   : > { %v1880_v56 = vadd.f32 %v1879_v54, %v1765_v43  ;;  %2170 = vmatprep.mubr.f32.mxu0 %v5594_v41  ;;  %v1952_v57 = vrot.slane %v5594_v41, 7  ;;  %v1972_v58 = vrot.slane %v5594_v41, 1  ;;  %4326 = vmatpush3.bf16.msra.mxu0 %v4325_v36  ;;  %v2012_v43 = vld [vmem:[%s6120_s9 + $0xc0] sm:$0xff]  ;;  %v2013_v54 = vld [vmem:[%s6120_s9 + $0xc8] sm:$0xff]  ;;  %v4335_v55 = vpack.c.bf16 %v2631_v34, %v2630_v52 }
 0x3b6   : > { %4328 = vmatprep.subr.bf16.mxu0 %v4327_v40  ;;  %v1994_v40 = vld [vmem:[%s6120_s9 + $0x30] sm:$0xff]  ;;  %v4271_v6 = vpack.c.bf16 %v2013_v54, %v2012_v43  ;;  %v2618_v54 = vld [vmem:[%s6120_s9 + $0x360] sm:$0xff] }
 0x3b7   : > { %v5624_v0 = vmax.f32 %v1880_v56, 0.0  ;;  %v3304_v1 = vpop.f32.mrb[52].mxu1  ;;  %v5629_v3 = vsel %vm552_vm1, %v4961_v32, %v1952_v57  ;;  %v5634_v2 = vsel %vm573_vm0, %v4964_v29, %v1972_v58  ;;  %v5639_v5 = vsel %vm573_vm0, %v1972_v58, %v4964_v29  ;;  %v2614_v56 = vld [vmem:[%s6120_s9 + $0x340] sm:$0xff] }
 0x3b8   : > { %v3305_v9 = vpop.f32.mrb[53].mxu1  ;;  %2171 = vmatmul.mubr.f32.gmra.mrb[64].mxu0 %v5629_v3  ;;  %3827 = vmatmul.mubr.f32.vlgmr.msra.gmra.mrb[60].mxu1 %v5634_v2  ;;  %v5658_v35 = vsel %vm552_vm1, %v1952_v57, %v4961_v32  ;;  %v2615_v57 = vld [vmem:[%s6120_s9 + $0x348] sm:$0xff]  ;;  %v4269_v60 = vpack.c.bf16 %v1995_v42, %v1994_v40  ;;  %v4277_v40 = vpack.c.bf16 %v1999_v30, %v1998_v27  ;;  %v2000_v42 = vld [vmem:[%s6120_s9 + $0x60] sm:$0xff]  ;;  %v2022_v30 = vld [vmem:[%s6120_s9 + $0x110] sm:$0xff] }
 0x3b9   : > { %v3306_v13 = vadd.f32 %v3305_v9, %v3304_v1  ;;  %4258 = vmatpush3.bf16.msra.mxu1 %v4257_v53  ;;  %3829 = vmatprep.mubr.f32.mxu1 %v5639_v5  ;;  %v1974_v20 = vrot.slane %v5624_v0, 1  ;;  %v1954_v21 = vrot.slane %v5624_v0, 7  ;;  %v4337_v9 = vpack.c.bf16 %v2615_v57, %v2614_v56 }
 0x3ba   : > { %2175 = vmatprep.mubr.f32.mxu0 %v4451_v31  ;;  %4260 = vmatprep.subr.bf16.mxu1 %v4259_v51 }
 0x3bb   : > { %v3790_v18 = vpop.f32.mrb[56].mxu0  ;;  %v1775_v19 = vadd.f32 %v3306_v13, %v5537_v4  ;;  %v5673_v17 = vsel %vm573_vm0, %v4964_v29, %v1974_v20  ;;  %v3307_v22 = vpop.f32.mrb[54].mxu1  ;;  %v5678_v23 = vsel %vm573_vm0, %v1974_v20, %v4964_v29  ;;  %4330 = vmatpush3.bf16.msra.mxu0 %v4329_v62  ;;  %v5714_v49 = vsel %vm552_vm1, %v4961_v32, %v1954_v21  ;;  %v2632_v62 = vld [vmem:[%s6120_s9 + $0x3d0] sm:$0xff] }
 0x3bc   : > { %v1889_v33 = vpop.f32.mrb[57].mxu0  ;;  %2176 = vmatmul.mubr.f32.gmra.mrb[66].mxu0 %v5658_v35  ;;  %3830 = vmatmul.mubr.f32.gmra.mrb[62].mxu1 %v5673_v17  ;;  %v3308_v48 = vpop.f32.mrb[55].mxu1  ;;  %v5737_v1 = vsel %vm552_vm1, %v1954_v21, %v4961_v32  ;;  %v2617_v18 = vld [vmem:[%s6120_s9 + $0x358] sm:$0xff]  ;;  %v4273_v21 = vpack.c.bf16 %v1997_v8, %v1996_v7  ;;  %v2002_v7 = vld [vmem:[%s6120_s9 + $0x70] sm:$0xff] }
 0x3bd   : > { %v1890_v36 = vadd.f32 %v1889_v33, %v1775_v19  ;;  %4262 = vmatpush3.bf16.msra.mxu1 %v4261_v28  ;;  %2180 = vmatprep.mubr.f32.mxu0 %v5624_v0  ;;  %v2016_v33 = vld [vmem:[%s6120_s9 + $0xe0] sm:$0xff]  ;;  %v4341_v34 = vpack.c.bf16 %v2617_v18, %v2616_v61  ;;  %v2021_v61 = vld [vmem:[%s6120_s9 + $0x108] sm:$0xff] }
 0x3be   : > { %3832 = vmatprep.mubr.f32.mxu1 %v5678_v23  ;;  %4264 = vmatprep.subr.bf16.mxu1 %v4263_v11  ;;  %v2638_v18 = vld [vmem:[%s6120_s9 + $0x400] sm:$0xff] }
 0x3bf   : > { %v5709_v45 = vmax.f32 %v1890_v36, 0.0  ;;  %v3310_v47 = vpop.f32.mrb[56].mxu1  ;;  %4332 = vmatprep.subr.bf16.mxu0 %v4331_v15  ;;  %v3793_v50 = vpop.f32.mrb[58].mxu0  ;;  %v4339_v15 = vpack.c.bf16 %v2633_v63, %v2632_v62  ;;  %v2017_v36 = vld [vmem:[%s6120_s9 + $0xe8] sm:$0xff]  ;;  %v2637_v62 = vld [vmem:[%s6120_s9 + $0x3f8] sm:$0xff] }
 0x3c0   : > { %v3311_v58 = vpop.f32.mrb[57].mxu1  ;;  %2181 = vmatmul.mubr.f32.gmra.mrb[68].mxu0 %v5714_v49  ;;  %v1899_v53 = vpop.f32.mrb[59].mxu0  ;;  %v4279_v43 = vpack.c.bf16 %v2017_v36, %v2016_v33  ;;  %v2023_v33 = vld [vmem:[%s6120_s9 + $0x118] sm:$0xff] }
 0x3c1   : > { %v3312_v51 = vadd.f32 %v3311_v58, %v3310_v47  ;;  %4266 = vmatpush3.bf16.msra.mxu1 %v4265_v37  ;;  %2185 = vmatprep.mubr.f32.mxu0 %v4451_v31  ;;  %v1976_v59 = vrot.slane %v5709_v45, 1  ;;  %v1956_v11 = vrot.slane %v5709_v45, 7  ;;  %v2634_v37 = vld [vmem:[%s6120_s9 + $0x3e0] sm:$0xff]  ;;  %v2001_v47 = vld [vmem:[%s6120_s9 + $0x68] sm:$0xff]  ;;  %v4291_v46 = vpack.c.bf16 %v2023_v33, %v2022_v30  ;;  %v2641_v36 = vld [vmem:[%s6120_s9 + $0x418] sm:$0xff] }
 0x3c2   : > { %4268 = vmatprep.subr.bf16.mxu1 %v4267_v38  ;;  %4334 = vmatpush3.bf16.msra.mxu0 %v4333_v39  ;;  %v2635_v38 = vld [vmem:[%s6120_s9 + $0x3e8] sm:$0xff]  ;;  %v4281_v63 = vpack.c.bf16 %v2001_v47, %v2000_v42  ;;  %v2642_v42 = vld [vmem:[%s6120_s9 + $0x420] sm:$0xff]  ;;  %v2026_v47 = vld [vmem:[%s6120_s9 + $0x130] sm:$0xff] }
 0x3c3   : > { %v1785_v13 = vadd.f32 %v3312_v51, %v5537_v4  ;;  %v5749_v20 = vsel %vm573_vm0, %v4964_v29, %v1976_v59  ;;  %v5754_v28 = vsel %vm573_vm0, %v1976_v59, %v4964_v29  ;;  %4336 = vmatprep.subr.bf16.mxu0 %v4335_v55  ;;  %v2015_v4 = vld [vmem:[%s6120_s9 + $0xd8] sm:$0xff]  ;;  %v3313_v14 = vpop.f32.mrb[58].mxu1  ;;  %v5787_v52 = vsel %vm552_vm1, %v4961_v32, %v1956_v11  ;;  %v2619_v55 = vld [vmem:[%s6120_s9 + $0x368] sm:$0xff]  ;;  %v2018_v51 = vld [vmem:[%s6120_s9 + $0xf0] sm:$0xff] }
 0x3c4   : > { %2186 = vmatmul.mubr.f32.gmra.mrb[70].mxu0 %v5737_v1  ;;  %3833 = vmatmul.mubr.f32.gmra.mrb[64].mxu1 %v5749_v20  ;;  %v3314_v19 = vpop.f32.mrb[59].mxu1  ;;  %v4275_v24 = vpack.c.bf16 %v2015_v4, %v2014_v12  ;;  %v4343_v50 = vpack.c.bf16 %v2635_v38, %v2634_v37  ;;  %v5816_v56 = vsel %vm552_vm1, %v1956_v11, %v4961_v32  ;;  %v2019_v59 = vld [vmem:[%s6120_s9 + $0xf8] sm:$0xff]  ;;  %v2024_v37 = vld [vmem:[%s6120_s9 + $0x120] sm:$0xff]  ;;  %v2025_v38 = vld [vmem:[%s6120_s9 + $0x128] sm:$0xff] }
 0x3c5   : > { %v1900_v22 = vadd.f32 %v1899_v53, %v1785_v13  ;;  %4270 = vmatpush3.bf16.msra.mxu1 %v4269_v60  ;;  %2190 = vmatprep.mubr.f32.mxu0 %v5709_v45  ;;  %v2636_v60 = vld [vmem:[%s6120_s9 + $0x3f0] sm:$0xff]  ;;  %v4283_v8 = vpack.c.bf16 %v2019_v59, %v2018_v51  ;;  %v2621_v11 = vld [vmem:[%s6120_s9 + $0x378] sm:$0xff]  ;;  %v5867_v4 = vsel %vm573_vm0, %v4964_v29, %v1970_v16  ;;  %v2639_v16 = vld [vmem:[%s6120_s9 + $0x408] sm:$0xff] }
 0x3c6   : > { %3835 = vmatprep.mubr.f32.mxu1 %v5754_v28  ;;  %4272 = vmatprep.subr.bf16.mxu1 %v4271_v6  ;;  %v4345_v6 = vpack.c.bf16 %v2619_v55, %v2618_v54  ;;  %v2620_v13 = vld [vmem:[%s6120_s9 + $0x370] sm:$0xff]  ;;  %v4347_v14 = vpack.c.bf16 %v2637_v62, %v2636_v60  ;;  %v4351_v27 = vpack.c.bf16 %v2639_v16, %v2638_v18  ;;  %v2645_v51 = vld [vmem:[%s6120_s9 + $0x438] sm:$0xff]  ;;  %v2029_v59 = vld [vmem:[%s6120_s9 + $0x148] sm:$0xff] }
 0x3c7   : > { %v5782_v48 = vmax.f32 %v1900_v22, 0.0  ;;  %4338 = vmatpush3.bf16.msra.mxu0 %v4337_v9  ;;  %v2003_v9 = vld [vmem:[%s6120_s9 + $0x78] sm:$0xff]  ;;  %v4349_v22 = vpack.c.bf16 %v2621_v11, %v2620_v13  ;;  %v2646_v62 = vld [vmem:[%s6120_s9 + $0x440] sm:$0xff]  ;;  %v2033_v11 = vld [vmem:[%s6120_s9 + $0x168] sm:$0xff] }
 0x3c8   : > { %2191 = vmatmul.mubr.f32.gmra.mrb[72].mxu0 %v5787_v52  ;;  %4340 = vmatprep.subr.bf16.mxu0 %v4339_v15  ;;  %v2020_v15 = vld [vmem:[%s6120_s9 + $0x100] sm:$0xff]  ;;  %v4285_v19 = vpack.c.bf16 %v2003_v9, %v2002_v7  ;;  %v2031_v7 = vld [vmem:[%s6120_s9 + $0x158] sm:$0xff]  ;;  %v2648_v9 = vld [vmem:[%s6120_s9 + $0x450] sm:$0xff] }
 0x3c9   : > { %4274 = vmatpush3.bf16.msra.mxu1 %v4273_v21  ;;  %2195 = vmatprep.mubr.f32.mxu0 %v4451_v31  ;;  %v2043_v39 = vrot.slane %v5782_v48, 1  ;;  %v2038_v53 = vrot.slane %v5782_v48, 7  ;;  %v4287_v21 = vpack.c.bf16 %v2021_v61, %v2020_v15  ;;  %v2649_v13 = vld [vmem:[%s6120_s9 + $0x458] sm:$0xff]  ;;  %v2650_v15 = vld [vmem:[%s6120_s9 + $0x460] sm:$0xff]  ;;  %v2651_v61 = vld [vmem:[%s6120_s9 + $0x468] sm:$0xff] }
 0x3ca   : > { %4276 = vmatprep.subr.bf16.mxu1 %v4275_v24  ;;  %v2034_v18 = vld [vmem:[%s6120_s9 + $0x170] sm:$0xff]  ;;  %v2035_v16 = vld [vmem:[%s6120_s9 + $0x178] sm:$0xff] }
 0x3cb   : > { %v5821_v57 = vsel %vm573_vm0, %v4964_v29, %v2043_v39  ;;  %v5826_v58 = vsel %vm573_vm0, %v2043_v39, %v4964_v29  ;;  %4342 = vmatpush3.bf16.msra.mxu0 %v4341_v34  ;;  %v5860_v12 = vsel %vm552_vm1, %v4961_v32, %v2038_v53  ;;  %v5887_v24 = vsel %vm552_vm1, %v2038_v53, %v4961_v32  ;;  %v2640_v34 = vld [vmem:[%s6120_s9 + $0x410] sm:$0xff] }
 0x3cc   : > { %2196 = vmatmul.mubr.f32.gmra.mrb[74].mxu0 %v5816_v56  ;;  %3836 = vmatmul.mubr.f32.gmra.mrb[66].mxu1 %v5821_v57  ;;  %v4355_v39 = vpack.c.bf16 %v2641_v36, %v2640_v34  ;;  %v2644_v53 = vld [vmem:[%s6120_s9 + $0x430] sm:$0xff] }
 0x3cd   : > { %4278 = vmatpush3.bf16.msra.mxu1 %v4277_v40  ;;  %2200 = vmatprep.mubr.f32.mxu0 %v5782_v48  ;;  %v4295_v40 = vpack.c.bf16 %v2025_v38, %v2024_v37  ;;  %v4363_v60 = vpack.c.bf16 %v2645_v51, %v2644_v53 }
 0x3ce   : > { %3838 = vmatprep.mubr.f32.mxu1 %v5826_v58  ;;  %4280 = vmatprep.subr.bf16.mxu1 %v4279_v43  ;;  %v2643_v43 = vld [vmem:[%s6120_s9 + $0x428] sm:$0xff] }
 0x3cf   : > { %4344 = vmatprep.subr.bf16.mxu0 %v4343_v50  ;;  %v2027_v50 = vld [vmem:[%s6120_s9 + $0x138] sm:$0xff]  ;;  %v4359_v54 = vpack.c.bf16 %v2643_v43, %v2642_v42 }
 0x3d0   : > { %2201 = vmatmul.mubr.f32.gmra.mrb[76].mxu0 %v5860_v12  ;;  %3839 = vmatmul.mubr.f32.gmra.mrb[68].mxu1 %v5867_v4  ;;  %v4299_v55 = vpack.c.bf16 %v2027_v50, %v2026_v47 }
 0x3d1   : > { %4282 = vmatpush3.bf16.msra.mxu1 %v4281_v63  ;;  %4346 = vmatpush3.bf16.msra.mxu0 %v4345_v6  ;;  %v2647_v63 = vld [vmem:[%s6120_s9 + $0x448] sm:$0xff]  ;;  %v2030_v6 = vld [vmem:[%s6120_s9 + $0x150] sm:$0xff] }
 0x3d2   : > { %2205 = vmatprep.mubr.f32.mxu0 %v4451_v31  ;;  %4284 = vmatprep.subr.bf16.mxu1 %v4283_v8  ;;  %v4367_v8 = vpack.c.bf16 %v2647_v63, %v2646_v62 }
 0x3d3   : > { %4348 = vmatprep.subr.bf16.mxu0 %v4347_v14  ;;  %2390 = vmatprep.mubr.f32.mxu1 %v4451_v31  ;;  %v4371_v14 = vpack.c.bf16 %v2649_v13, %v2648_v9 }
 0x3d4   : > { %2206 = vmatmul.mubr.f32.gmra.mrb[78].mxu0 %v5887_v24 }
 0x3d5   : > { %4286 = vmatpush3.bf16.msra.mxu1 %v4285_v19  ;;  %4350 = vmatpush3.bf16.msra.mxu0 %v4349_v22  ;;  %v4375_v19 = vpack.c.bf16 %v2651_v61, %v2650_v15  ;;  %v2652_v22 = vld [vmem:[%s6120_s9 + $0x470] sm:$0xff] }
 0x3d6   : > { %2718 = vmatprep.mubr.f32.mxu0 %v5594_v41  ;;  %4288 = vmatprep.subr.bf16.mxu1 %v4287_v21 }
 0x3d7   : > { %4352 = vmatprep.subr.bf16.mxu0 %v4351_v27 }
 0x3d8   : > { %2391 = vmatmul.mubr.f32.vlgmr.msra.gmra.mrb[70].mxu1 %v4961_v32  ;;  %2719 = vmatmul.mubr.f32.vlgmr.msra.gmra.mrb[80].mxu0 %v5629_v3 }
 0x3d9   : > { %4290 = vmatpush3.bf16.msra.mxu1 %v4287_v21  ;;  %2395 = vmatprep.mubr.f32.mxu1 %v4451_v31  ;;  %v2653_v21 = vld [vmem:[%s6120_s9 + $0x478] sm:$0xff] }
 0x3da   : > { %2723 = vmatprep.mubr.f32.mxu0 %v4451_v31  ;;  %4292 = vmatprep.subr.bf16.mxu1 %v4291_v46 }
 0x3db   : > { %4354 = vmatpush3.bf16.msra.mxu0 %v4351_v27 }
 0x3dc   : > { %2396 = vmatmul.mubr.f32.gmra.mrb[72].mxu1 %v4961_v32  ;;  %2724 = vmatmul.mubr.f32.gmra.mrb[82].mxu0 %v5658_v35 }
 0x3dd   : > { %2400 = vmatprep.mubr.f32.mxu1 %v5546_v10  ;;  %4294 = vmatpush3.bf16.msra.mxu1 %v4291_v46  ;;  %v2028_v10 = vld [vmem:[%s6120_s9 + $0x140] sm:$0xff] }
 0x3de   : > { %2728 = vmatprep.mubr.f32.mxu0 %v5624_v0  ;;  %4356 = vmatprep.subr.bf16.mxu0 %v4355_v39 }
 0x3df   : > { %4296 = vmatprep.subr.bf16.mxu1 %v4295_v40  ;;  %4358 = vmatpush3.bf16.msra.mxu0 %v4355_v39 }
 0x3e0   : > { %2401 = vmatmul.mubr.f32.gmra.mrb[74].mxu1 %v5567_v25  ;;  %2729 = vmatmul.mubr.f32.gmra.mrb[84].mxu0 %v5714_v49  ;;  %v4303_v25 = vpack.c.bf16 %v2029_v59, %v2028_v10 }
 0x3e1   : > { %2405 = vmatprep.mubr.f32.mxu1 %v4451_v31  ;;  %4298 = vmatpush3.bf16.msra.mxu1 %v4295_v40 }
 0x3e2   : > { %2733 = vmatprep.mubr.f32.mxu0 %v4451_v31  ;;  %4360 = vmatprep.subr.bf16.mxu0 %v4359_v54 }
 0x3e3   : > { %4300 = vmatprep.subr.bf16.mxu1 %v4299_v55  ;;  %4362 = vmatpush3.bf16.msra.mxu0 %v4359_v54 }
 0x3e4   : > { %2406 = vmatmul.mubr.f32.gmra.mrb[76].mxu1 %v5600_v44  ;;  %2734 = vmatmul.mubr.f32.gmra.mrb[86].mxu0 %v5737_v1  ;;  %v4307_v44 = vpack.c.bf16 %v2031_v7, %v2030_v6 }
 0x3e5   : > { %2410 = vmatprep.mubr.f32.mxu1 %v5594_v41  ;;  %2738 = vmatprep.mubr.f32.mxu0 %v5709_v45  ;;  %v2032_v41 = vld [vmem:[%s6120_s9 + $0x160] sm:$0xff] }
 0x3e6   : > { %4302 = vmatpush3.bf16.msra.mxu1 %v4299_v55  ;;  %4364 = vmatprep.subr.bf16.mxu0 %v4363_v60 }
 0x3e7   : > { %4304 = vmatprep.subr.bf16.mxu1 %v4303_v25  ;;  %4366 = vmatpush3.bf16.msra.mxu0 %v4363_v60 }
 0x3e8   : > { %2411 = vmatmul.mubr.f32.gmra.mrb[78].mxu1 %v5629_v3  ;;  %2739 = vmatmul.mubr.f32.gmra.mrb[88].mxu0 %v5787_v52  ;;  %v4311_v3 = vpack.c.bf16 %v2033_v11, %v2032_v41 }
 0x3e9   : > { %2415 = vmatprep.mubr.f32.mxu1 %v4451_v31  ;;  %2743 = vmatprep.mubr.f32.mxu0 %v4451_v31 }
 0x3ea   : > { %4306 = vmatpush3.bf16.msra.mxu1 %v4303_v25  ;;  %4368 = vmatprep.subr.bf16.mxu0 %v4367_v8 }
 0x3eb   : > { %4308 = vmatprep.subr.bf16.mxu1 %v4307_v44  ;;  %4370 = vmatpush3.bf16.msra.mxu0 %v4367_v8 }
 0x3ec   : > { %2416 = vmatmul.mubr.f32.gmra.mrb[80].mxu1 %v5658_v35  ;;  %2744 = vmatmul.mubr.f32.gmra.mrb[90].mxu0 %v5816_v56  ;;  %v4315_v35 = vpack.c.bf16 %v2035_v16, %v2034_v18 }
 0x3ed   : > { %2420 = vmatprep.mubr.f32.mxu1 %v5624_v0  ;;  %2748 = vmatprep.mubr.f32.mxu0 %v5782_v48  ;;  %v4379_v0 = vpack.c.bf16 %v2653_v21, %v2652_v22 }
 0x3ee   : > { %4310 = vmatpush3.bf16.msra.mxu1 %v4307_v44  ;;  %4372 = vmatprep.subr.bf16.mxu0 %v4371_v14 }
 0x3ef   : > { %4312 = vmatprep.subr.bf16.mxu1 %v4311_v3  ;;  %4374 = vmatpush3.bf16.msra.mxu0 %v4371_v14 }
 0x3f0   : > { %2421 = vmatmul.mubr.f32.gmra.mrb[82].mxu1 %v5714_v49  ;;  %2749 = vmatmul.mubr.f32.gmra.mrb[92].mxu0 %v5860_v12 }
 0x3f1   : > { %2425 = vmatprep.mubr.f32.mxu1 %v4451_v31  ;;  %2753 = vmatprep.mubr.f32.mxu0 %v4451_v31 }
 0x3f2   : > { %4314 = vmatpush3.bf16.msra.mxu1 %v4311_v3  ;;  %4376 = vmatprep.subr.bf16.mxu0 %v4375_v19 }
 0x3f3   : > { %4378 = vmatpush3.bf16.msra.mxu0 %v4375_v19  ;;  %4316 = vmatprep.subr.bf16.mxu1 %v4315_v35 }
 0x3f4   : > { %2426 = vmatmul.mubr.f32.gmra.mrb[84].mxu1 %v5737_v1  ;;  %2754 = vmatmul.mubr.f32.gmra.mrb[94].mxu0 %v5887_v24 }
 0x3f5   : > { %2430 = vmatprep.mubr.f32.mxu1 %v5709_v45  ;;  %2758 = vmatprep.mubr.f32.mxu0 %v4451_v31 }
 0x3f6   : > { %4318 = vmatpush3.bf16.msra.mxu1 %v4315_v35  ;;  %4380 = vmatprep.subr.bf16.mxu0 %v4379_v0 }
 0x3f7   : > { %4382 = vmatpush3.bf16.msra.mxu0 %v4379_v0 }
 0x3f8   : > { %2431 = vmatmul.mubr.f32.gmra.mrb[86].mxu1 %v5787_v52  ;;  %2759 = vmatmul.mubr.f32.gmra.mrb[96].mxu0 %v4961_v32 }
 0x3f9   : > { %2435 = vmatprep.mubr.f32.mxu1 %v4451_v31  ;;  %2763 = vmatprep.mubr.f32.mxu0 %v4451_v31 }
 0x3fc   : > { %2436 = vmatmul.mubr.f32.gmra.mrb[88].mxu1 %v5816_v56  ;;  %2764 = vmatmul.mubr.f32.gmra.mrb[98].mxu0 %v4961_v32 }
 0x3fd   : > { %3920 = vmatprep.mubr.f32.mxu0 %v5639_v5  ;;  %3873 = vmatprep.mubr.f32.mxu1 %v4964_v29 }
 0x400   : > { %3874 = vmatmul.mubr.f32.vlgmr.msra.gmra.mrb[60].mxu1 %v5867_v4  ;;  %3921 = vmatmul.mubr.f32.vlgmr.msra.gmra.mrb[100].mxu0 %v5673_v17 }
 0x401   : > { %3876 = vmatprep.mubr.f32.mxu1 %v5574_v26  ;;  %3923 = vmatprep.mubr.f32.mxu0 %v5678_v23 }
 0x404   : > { %3877 = vmatmul.mubr.f32.gmra.mrb[62].mxu1 %v5634_v2  ;;  %3924 = vmatmul.mubr.f32.gmra.mrb[102].mxu0 %v5749_v20 }
 0x405   : > { %3879 = vmatprep.mubr.f32.mxu1 %v5639_v5  ;;  %3926 = vmatprep.mubr.f32.mxu0 %v5754_v28 }
 0x408   : > { %3880 = vmatmul.mubr.f32.gmra.mrb[64].mxu1 %v5673_v17  ;;  %3927 = vmatmul.mubr.f32.gmra.mrb[104].mxu0 %v5821_v57 }
 0x409   : > { %3882 = vmatprep.mubr.f32.mxu1 %v5678_v23  ;;  %3929 = vmatprep.mubr.f32.mxu0 %v5826_v58 }
 0x40c   : > { %3883 = vmatmul.mubr.f32.gmra.mrb[66].mxu1 %v5749_v20  ;;  %3930 = vmatmul.mubr.f32.gmra.mrb[106].mxu0 %v4964_v29 }
 0x40d   : > { %3885 = vmatprep.mubr.f32.mxu1 %v5754_v28  ;;  %3932 = vmatprep.mubr.f32.mxu0 %v4964_v29 }
 0x410   : > { %3886 = vmatmul.mubr.f32.gmra.mrb[68].mxu1 %v4964_v29  ;;  %3933 = vmatmul.mubr.f32.gmra.mrb[108].mxu0 %v5634_v2 }
 0x483   : > { %v3374_v31 = vpop.f32.mrb[60].mxu0 }
 0x484   : > { %v3375_v32 = vpop.f32.mrb[61].mxu0 }
 0x485   : > { %v3376_v26 = vadd.f32 %v3375_v32, %v3374_v31 }
 0x487   : > { %v3377_v5 = vpop.f32.mrb[62].mxu0 }
 0x488   : > { %v3378_v17 = vpop.f32.mrb[63].mxu0 }
 0x489   : > { %v3379_v23 = vadd.f32 %v3378_v17, %v3377_v5 }
 0x48b   : > { %v3380_v45 = vpop.f32.mrb[64].mxu0 }
 0x48c   : > { %v3381_v49 = vpop.f32.mrb[65].mxu0 }
 0x48d   : > { %v3382_v1 = vadd.f32 %v3381_v49, %v3380_v45 }
 0x48f   : > { %v3383_v20 = vpop.f32.mrb[66].mxu0 }
 0x490   : > { %v3384_v48 = vpop.f32.mrb[67].mxu0 }
 0x491   : > { %v3385_v52 = vadd.f32 %v3384_v48, %v3383_v20 }
 0x493   : > { %v3386_v56 = vpop.f32.mrb[68].mxu0 }
 0x494   : > { %v3387_v28 = vpop.f32.mrb[69].mxu0 }
 0x495   : > { %v3388_v57 = vadd.f32 %v3387_v28, %v3386_v56 }
 0x497   : > { %v3389_v58 = vpop.f32.mrb[70].mxu0 }
 0x498   : > { %v3390_v12 = vpop.f32.mrb[71].mxu0 }
 0x499   : > { %v3391_v29 = vadd.f32 %v3390_v12, %v3389_v58 }
 0x49b   : > { %v3392_v4 = vpop.f32.mrb[72].mxu0 }
 0x49c   : > { %v3393_v2 = vpop.f32.mrb[73].mxu0 }
 0x49d   : > { %v3394_v24 = vadd.f32 %v3393_v2, %v3392_v4 }
 0x49f   : > { %v3395_v27 = vpop.f32.mrb[74].mxu0 }
 0x4a0   : > { %v3396_v30 = vpop.f32.mrb[75].mxu0 }
 0x4a1   : > { %v6034_v33 = vadd.f32 %v3396_v30, %v3395_v27 }
 0x4a3   : > { %v3398_v46 = vpop.f32.mrb[76].mxu0 }
 0x4a4   : > { %v3399_v34 = vpop.f32.mrb[77].mxu0 }
 0x4a5   : > { %v6036_v36 = vadd.f32 %v3399_v34, %v3398_v46 }
 0x4a7   : > { %v3401_v37 = vpop.f32.mrb[78].mxu0 }
 0x4a8   : > { %v3402_v38 = vpop.f32.mrb[79].mxu0 }
 0x4a9   : > { %v6038_v39 = vadd.f32 %v3402_v38, %v3401_v37 }
 0x4ab   : > { %v3462_v40 = vpop.f32.mrb[70].mxu1  ;;  %v3550_v42 = vpop.f32.mrb[80].mxu0 }
 0x4ac   : > { %v3463_v43 = vpop.f32.mrb[71].mxu1  ;;  %v3551_v47 = vpop.f32.mrb[81].mxu0 }
 0x4ad   : > { %v3464_v50 = vadd.f32 %v3463_v43, %v3462_v40  ;;  %v6040_v54 = vadd.f32 %v3551_v47, %v3550_v42 }
 0x4af   : > { %v3465_v55 = vpop.f32.mrb[72].mxu1  ;;  %v3553_v53 = vpop.f32.mrb[82].mxu0  ;;  %v6042_v51 = vadd.f32 %v3464_v50, %v3376_v26 }
 0x4b0   : > { %v3466_v10 = vpop.f32.mrb[73].mxu1  ;;  %v3554_v59 = vpop.f32.mrb[83].mxu0 }
 0x4b1   : > { %v3467_v60 = vadd.f32 %v3466_v10, %v3465_v55  ;;  %v6044_v25 = vadd.f32 %v3554_v59, %v3553_v53 }
 0x4b3   : > { %v3468_v62 = vpop.f32.mrb[74].mxu1  ;;  %v3556_v63 = vpop.f32.mrb[84].mxu0  ;;  %v4383_v6 = vadd.f32 %v3467_v60, %v3379_v23 }
 0x4b4   : > { %v3469_v7 = vpop.f32.mrb[75].mxu1  ;;  %v3557_v8 = vpop.f32.mrb[85].mxu0 }
 0x4b5   : > { %v3470_v44 = vadd.f32 %v3469_v7, %v3468_v62  ;;  %v6046_v9 = vadd.f32 %v3557_v8, %v3556_v63 }
 0x4b7   : > { %v3471_v13 = vpop.f32.mrb[76].mxu1  ;;  %v3559_v41 = vpop.f32.mrb[86].mxu0  ;;  %v6048_v11 = vadd.f32 %v3470_v44, %v3382_v1 }
 0x4b8   : > { %v3472_v14 = vpop.f32.mrb[77].mxu1  ;;  %v3560_v3 = vpop.f32.mrb[87].mxu0 }
 0x4b9   : > { %v3473_v15 = vadd.f32 %v3472_v14, %v3471_v13  ;;  %v6050_v61 = vadd.f32 %v3560_v3, %v3559_v41 }
 0x4bb   : > { %v3474_v18 = vpop.f32.mrb[78].mxu1  ;;  %v3562_v16 = vpop.f32.mrb[88].mxu0  ;;  %v4391_v19 = vadd.f32 %v3473_v15, %v3385_v52 }
 0x4bc   : > { %v3475_v35 = vpop.f32.mrb[79].mxu1  ;;  %v3563_v22 = vpop.f32.mrb[89].mxu0 }
 0x4bd   : > { %v3476_v21 = vadd.f32 %v3475_v35, %v3474_v18  ;;  %v6052_v0 = vadd.f32 %v3563_v22, %v3562_v16 }
 0x4bf   : > { %v3477_v31 = vpop.f32.mrb[80].mxu1  ;;  %v3565_v32 = vpop.f32.mrb[90].mxu0  ;;  %v6054_v26 = vadd.f32 %v3476_v21, %v3388_v57 }
 0x4c0   : > { %v3478_v5 = vpop.f32.mrb[81].mxu1  ;;  %v3566_v17 = vpop.f32.mrb[91].mxu0 }
 0x4c1   : > { %v3479_v23 = vadd.f32 %v3478_v5, %v3477_v31  ;;  %v6056_v45 = vadd.f32 %v3566_v17, %v3565_v32 }
 0x4c3   : > { %v3480_v49 = vpop.f32.mrb[82].mxu1  ;;  %v3568_v1 = vpop.f32.mrb[92].mxu0  ;;  %v4399_v20 = vadd.f32 %v3479_v23, %v3391_v29 }
 0x4c4   : > { %v3481_v48 = vpop.f32.mrb[83].mxu1  ;;  %v3569_v56 = vpop.f32.mrb[93].mxu0 }
 0x4c5   : > { %v3482_v52 = vadd.f32 %v3481_v48, %v3480_v49  ;;  %v6058_v28 = vadd.f32 %v3569_v56, %v3568_v1 }
 0x4c7   : > { %v3483_v58 = vpop.f32.mrb[84].mxu1  ;;  %v3571_v12 = vpop.f32.mrb[94].mxu0  ;;  %v6060_v4 = vadd.f32 %v3482_v52, %v3394_v24 }
 0x4c8   : > { %v3484_v2 = vpop.f32.mrb[85].mxu1  ;;  %v3572_v57 = vpop.f32.mrb[95].mxu0 }
 0x4c9   : > { %v3485_v27 = vadd.f32 %v3484_v2, %v3483_v58  ;;  %v6062_v30 = vadd.f32 %v3572_v57, %v3571_v12 }
 0x4cb   : > { %v3486_v46 = vpop.f32.mrb[86].mxu1  ;;  %v3574_v34 = vpop.f32.mrb[96].mxu0  ;;  %v4407_v37 = vadd.f32 %v3485_v27, %v6034_v33 }
 0x4cc   : > { %v3487_v38 = vpop.f32.mrb[87].mxu1  ;;  %v3575_v29 = vpop.f32.mrb[97].mxu0 }
 0x4cd   : > { %v3488_v40 = vadd.f32 %v3487_v38, %v3486_v46  ;;  %v6065_v42 = vadd.f32 %v3575_v29, %v3574_v34 }
 0x4cf   : > { %v3489_v43 = vpop.f32.mrb[88].mxu1  ;;  %v3577_v47 = vpop.f32.mrb[98].mxu0  ;;  %v6068_v50 = vadd.f32 %v3488_v40, %v6036_v36  ;;  %v2987_v36 = vld [vmem:[%s6121_s10] ss:$0 sm:$0xff] }
 0x4d0   : > { %v3490_v24 = vpop.f32.mrb[89].mxu1  ;;  %v3578_v55 = vpop.f32.mrb[99].mxu0 }
 0x4d1   : > { %v3491_v53 = vadd.f32 %v3490_v24, %v3489_v43  ;;  %v6070_v10 = vadd.f32 %v3578_v55, %v3577_v47 }
 0x4d3   : > { %v3875_v59 = vpop.f32.mrb[60].mxu1  ;;  %v3922_v60 = vpop.f32.mrb[100].mxu0  ;;  %v4415_v33 = vadd.f32 %v3491_v53, %v6038_v39 }
 0x4d4   : > { %v4384_v62 = vadd.f32 %v4383_v6, %v3875_v59  ;;  %v2507_v63 = vpop.f32.mrb[61].mxu1  ;;  %v2835_v7 = vpop.f32.mrb[101].mxu0 }
 0x4d5   : > { %v4388_v8 = vadd.f32 %v6042_v51, %v2507_v63 }
 0x4d6   : > { %v4385_v44 = vadd.f32 %v4384_v62, %v6044_v25 }
 0x4d7   : > { %v4389_v13 = vadd.f32 %v4388_v8, %v6040_v54  ;;  %v3878_v41 = vpop.f32.mrb[62].mxu1  ;;  %v3925_v14 = vpop.f32.mrb[102].mxu0 }
 0x4d8   : > { %v4386_v3 = vadd.f32 %v4385_v44, %v3922_v60  ;;  %v4392_v15 = vadd.f32 %v4391_v19, %v3878_v41  ;;  %v2517_v18 = vpop.f32.mrb[63].mxu1  ;;  %v2845_v16 = vpop.f32.mrb[103].mxu0 }
 0x4d9   : > { %v4390_v39 = vadd.f32 %v4389_v13, %v2835_v7  ;;  %v4396_v51 = vadd.f32 %v6048_v11, %v2517_v18 }
 0x4da   : > { %v2902_v25 = vadd.f32 %v4386_v3, %v2987_v36  ;;  %v4393_v54 = vadd.f32 %v4392_v15, %v6050_v61 }
 0x4db   : > { %v2901_v6 = vadd.f32 %v4390_v39, %v2987_v36  ;;  %v4397_v35 = vadd.f32 %v4396_v51, %v6046_v9  ;;  %v3881_v19 = vpop.f32.mrb[64].mxu1  ;;  %v3928_v22 = vpop.f32.mrb[104].mxu0 }
 0x4dc   : > { %2912 = vst [vmem:[%s6084_s21 + $0x8] sm:$0xff] %v2902_v25  ;;  %v4394_v21 = vadd.f32 %v4393_v54, %v3925_v14  ;;  %v4400_v31 = vadd.f32 %v4399_v20, %v3881_v19  ;;  %v2527_v32 = vpop.f32.mrb[65].mxu1  ;;  %v2855_v5 = vpop.f32.mrb[105].mxu0 }
 0x4dd   : > { %2911 = vst [vmem:[%s6084_s21] sm:$0xff] %v2901_v6  ;;  %v4398_v17 = vadd.f32 %v4397_v35, %v2845_v16  ;;  %v4404_v23 = vadd.f32 %v6054_v26, %v2527_v32 }
 0x4de   : > { %v2904_v11 = vadd.f32 %v4394_v21, %v2987_v36  ;;  %v4401_v49 = vadd.f32 %v4400_v31, %v6056_v45 }
 0x4df   : > { %v2903_v61 = vadd.f32 %v4398_v17, %v2987_v36  ;;  %v4405_v1 = vadd.f32 %v4404_v23, %v6052_v0  ;;  %v3884_v9 = vpop.f32.mrb[66].mxu1  ;;  %v3931_v48 = vpop.f32.mrb[106].mxu0 }
 0x4e0   : > { %2914 = vst [vmem:[%s6084_s21 + $0x18] sm:$0xff] %v2904_v11  ;;  %v4402_v56 = vadd.f32 %v4401_v49, %v3928_v22  ;;  %v4408_v52 = vadd.f32 %v4407_v37, %v3884_v9  ;;  %v2537_v20 = vpop.f32.mrb[67].mxu1  ;;  %v2865_v58 = vpop.f32.mrb[107].mxu0 }
 0x4e1   : > { %2913 = vst [vmem:[%s6084_s21 + $0x10] sm:$0xff] %v2903_v61  ;;  %v4406_v12 = vadd.f32 %v4405_v1, %v2855_v5  ;;  %v4412_v2 = vadd.f32 %v6060_v4, %v2537_v20 }
 0x4e2   : > { %v2906_v26 = vadd.f32 %v4402_v56, %v2987_v36  ;;  %v4409_v57 = vadd.f32 %v4408_v52, %v6062_v30 }
 0x4e3   : > { %v2905_v45 = vadd.f32 %v4406_v12, %v2987_v36  ;;  %v3887_v27 = vpop.f32.mrb[68].mxu1  ;;  %v4413_v0 = vadd.f32 %v4412_v2, %v6058_v28  ;;  %v3934_v46 = vpop.f32.mrb[108].mxu0 }
 0x4e4   : > { %2916 = vst [vmem:[%s6084_s21 + $0x28] sm:$0xff] %v2906_v26  ;;  %v4410_v34 = vadd.f32 %v4409_v57, %v3931_v48  ;;  %v4416_v37 = vadd.f32 %v4415_v33, %v3887_v27  ;;  %v2547_v38 = vpop.f32.mrb[69].mxu1  ;;  %v2875_v29 = vpop.f32.mrb[109].mxu0 }
 0x4e5   : > { %2915 = vst [vmem:[%s6084_s21 + $0x20] sm:$0xff] %v2905_v45  ;;  %v4414_v40 = vadd.f32 %v4413_v0, %v2865_v58  ;;  %v4420_v4 = vadd.f32 %v6068_v50, %v2547_v38 }
 0x4e6   : > { %v2908_v43 = vadd.f32 %v4410_v34, %v2987_v36  ;;  %v4417_v30 = vadd.f32 %v4416_v37, %v6070_v10 }
 0x4e7   : > { %v2907_v47 = vadd.f32 %v4414_v40, %v2987_v36  ;;  %v4421_v24 = vadd.f32 %v4420_v4, %v6065_v42 }
 0x4e8   : > { %2918 = vst [vmem:[%s6084_s21 + $0x38] sm:$0xff] %v2908_v43  ;;  %v4418_v28 = vadd.f32 %v4417_v30, %v3934_v46 }
 0x4e9   : > { %2917 = vst [vmem:[%s6084_s21 + $0x30] sm:$0xff] %v2907_v47  ;;  %v4422_v55 = vadd.f32 %v4421_v24, %v2875_v29 }
 0x4ea   : > { %v2910_v53 = vadd.f32 %v4418_v28, %v2987_v36 }
 0x4eb   : > { %v2909_v59 = vadd.f32 %v4422_v55, %v2987_v36 }
 0x4ec   : > { %2920 = vst [vmem:[%s6084_s21 + $0x48] sm:$0xff] %v2910_v53 }
 0x4ed   : > { %2919 = vst [vmem:[%s6084_s21 + $0x40] sm:$0xff] %v2909_v59 }
 0x4ee PF: > { %s21_s17 = sadd.s32 1, %s4449_s17  }
 0x4ef   : > { %p18_p4 = scmp.ge.s32.totalorder %s21_s17, 4  }
 0x4f1   :  { %20 = sbr.rel (!%p18_p4) target bundleno = 1 (0x1), region = 94 }

</bundles_post_ra>
